<compile_context>
chip_gen: v7x
topology: tpu7x:2x2x1
jax: 0.10.0
libtpu: 0.0.40
codegen_flags: <defaults>
</compile_context>

<pallas_src>
import functools

import jax
import jax.numpy as jnp
from jax.experimental import pallas as pl
from jax.experimental.pallas import tpu as pltpu

F_PAD = 32         # padded feature width (lane dim) -- was 128
TB_MAX = 1024      # max batch tile (sublane dim); sweepable 512-2048

# lane layout inside the packed input / output
X_LO, X_HI = 0, 6          # x in packed input
EPS_LO, EPS_HI = 8, 12     # eps in packed input == "compute" lanes for z
ZM_LO, ZM_HI = 4, 8        # z_mean in packed output
Z_LO, Z_HI = 8, 12         # z (encoded) in packed output (same lanes as eps)
ZL_LO, ZL_HI = 12, 16      # z_log_var in packed output
D_LO, D_HI = 16, 22        # decoded in packed output


# ----------------------------- Pallas kernel --------------------------------
def vae_kernel(x_ref, w_ref, b_ref, out_ref):
    xin = x_ref[...]                                    # (TB, 32)
    biases = b_ref[...]                                 # (8, 32)
    lane = jax.lax.broadcasted_iota(jnp.int32, xin.shape, 1)

    def lin(h, i):
        return (jnp.dot(h, w_ref[i], preferred_element_type=jnp.float32)
                + biases[i:i + 1, :])

    def leaky(v):                                       # torch default slope 0.01
        return jnp.where(v > 0, v, 0.01 * v)

    # encoder (eps lanes of xin hit zero weight rows, so they contribute nothing)
    h = leaky(lin(xin, 0))          # Linear(6,5): result in lanes 0:5
    h = leaky(lin(h, 1))            # Linear(5,4): result in lanes 0:4

    # latent heads; columns pre-placed: zm -> {4:8, 8:12}, zl -> {8:12, 12:16}
    zm = lin(h, 2)                  # z_mean
    zl = lin(h, 3)                  # z_log_var

    # reparameterize: z = mu + eps * exp(log_var / 2), computed at lanes 8:12.
    # eps padding is exactly zero, so all other lanes stay untouched
    # (lanes 4:8 keep the z_mean output copy).
    eps = jnp.where((lane >= EPS_LO) & (lane < EPS_HI), xin, 0.0)
    z = zm + eps * jnp.exp(zl * 0.5)

    # decoder: first weight reads z from rows 8:12 (zm copy at 4:8 hits zero rows)
    d = jnp.maximum(lin(z, 4), 0.0)    # Linear(4,4): lanes 0:4
    d = jnp.maximum(lin(d, 5), 0.0)    # Linear(4,5): lanes 0:5
    d = lin(d, 6)                      # Linear(5,6): lands directly at lanes 16:22

    # pack: [ .. | z_mean 4:8 | z 8:12 | z_log_var 12:16 | decoded 16:22 | .. ]
    zl_out = jnp.where((lane >= ZL_LO) & (lane < ZL_HI), zl, 0.0)
    out_ref[...] = z + zl_out + d      # single 32-lane dense store


# ------------------------------- wrapper -------------------------------------
def _round_up(n, m):
    return ((n + m - 1) // m) * m


def _cdiv(a, b):
    return -(-a // b)


# per layer (forward order): (input_row_offset, (output_col_offsets...))
_PLACEMENTS = (
    (X_LO, (0,)),          # encoder Linear(6,5)
    (0, (0,)),             # encoder Linear(5,4)
    (0, (ZM_LO, Z_LO)),    # z_mean Linear(4,4): output copy + compute copy
    (0, (Z_LO, ZL_LO)),    # z_log_var Linear(4,4): compute copy + output copy
    (Z_LO, (0,)),          # decoder Linear(4,4): reads z from lanes 8:12
    (0, (0,)),             # decoder Linear(4,5)
    (0, (D_LO,)),          # decoder Linear(5,6): writes straight to lanes 16:22
)


def pack_params(params):
    """Pack 7 (W, b) pairs into one (7,32,32) weight and one (8,32) bias array.

    Call ONCE outside the hot path and pass the results to vae_forward
    (hoisted out of the jitted forward per perf review)."""
    ws, bs = [], []
    for (w, b), (r0, cols) in zip(params, _PLACEMENTS):
        fi, fo = w.shape
        wp = jnp.zeros((F_PAD, F_PAD), jnp.float32)
        bp = jnp.zeros((F_PAD,), jnp.float32)
        for c in cols:
            wp = wp.at[r0:r0 + fi, c:c + fo].set(w.astype(jnp.float32))
            bp = bp.at[c:c + fo].set(b.astype(jnp.float32))
        ws.append(wp)
        bs.append(bp)
    w_all = jnp.stack(ws)                                            # (7,32,32)
    b_all = jnp.concatenate(
        [jnp.stack(bs), jnp.zeros((1, F_PAD), jnp.float32)], axis=0)  # (8,32)
    return w_all, b_all


@functools.partial(jax.jit, static_argnames=("tb_max",))
def vae_forward(x, eps, w_all, b_all, tb_max=TB_MAX):
    B = x.shape[0]

    # --- tile right-sizing: minimal batch padding, grid just big enough ---
    n_steps = max(1, _cdiv(B, tb_max))
    if B >= 512 and n_steps % 2 == 1:
        n_steps += 1                     # v7x: keep both TensorCores busy
    tb = _round_up(_cdiv(B, n_steps), 8)
    b_pad = n_steps * tb

    # pack x and eps into one lane-dense input (eps padding MUST stay zero)
    xin = jnp.zeros((b_pad, F_PAD), jnp.float32)
    xin = xin.at[:B, X_LO:X_HI].set(x.astype(jnp.float32))
    xin = xin.at[:B, EPS_LO:EPS_HI].set(eps.astype(jnp.float32))

    out = pl.pallas_call(
        vae_kernel,
        out_shape=jax.ShapeDtypeStruct((b_pad, F_PAD), jnp.float32),
        grid_spec=pltpu.PrefetchScalarGridSpec(
            num_scalar_prefetch=0,
            grid=(n_steps,),
            in_specs=[
                pl.BlockSpec((tb, F_PAD), lambda i: (i, 0)),
                pl.BlockSpec((7, F_PAD, F_PAD), lambda i: (0, 0, 0)),
                pl.BlockSpec((8, F_PAD), lambda i: (0, 0)),
            ],
            out_specs=pl.BlockSpec((tb, F_PAD), lambda i: (i, 0)),
        ),
        compiler_params=pltpu.CompilerParams(
            dimension_semantics=("parallel",),
        ),
    )(xin, w_all, b_all)

    encoded = out[:B, Z_LO:Z_HI]
    z_mean = out[:B, ZM_LO:ZM_HI]
    z_log_var = out[:B, ZL_LO:ZL_HI]
    decoded = out[:B, D_LO:D_HI]
    return encoded, z_mean, z_log_var, decoded


# ------------------------- deterministic parameters ---------------------------
def make_params(key):
    """Layer list: [(W(in,out), b(out)), ...] in forward order."""
    dims = [
        (6, 5), (5, 4),         # encoder
        (4, 4),                 # z_mean
        (4, 4),                 # z_log_var
        (4, 4), (4, 5), (5, 6)  # decoder
    ]
    params = []
    for (fi, fo) in dims:
        key, kw, kb = jax.random.split(key, 3)
        bound = 1.0 / jnp.sqrt(fi)
        w = jax.random.uniform(kw, (fi, fo), jnp.float32, -bound, bound)
        b = jax.random.uniform(kb, (fo,), jnp.float32, -bound, bound)
        params.append((w, b))
    return params


# ------------------------------ pure-JAX ref ----------------------------------
def vae_ref(x, eps, params):
    def lin(h, p):
        return h @ p[0] + p[1]

    leaky = lambda h: jnp.where(h > 0, h, 0.01 * h)
    h = leaky(lin(x, params[0]))
    h = leaky(lin(h, params[1]))
    zm = lin(h, params[2])
    zl = lin(h, params[3])
    z = zm + eps * jnp.exp(zl * 0.5)
    d = jnp.maximum(lin(z, params[4]), 0.0)
    d = jnp.maximum(lin(d, params[5]), 0.0)
    d = lin(d, params[6])
    return z, zm, zl, d


# ---------------------------------- main --------------------------------------
if __name__ == "__main__":
    key = jax.random.PRNGKey(0)
    k_params, k_x, k_eps = jax.random.split(key, 3)

    params = make_params(k_params)
    w_all, b_all = pack_params(params)   # packed ONCE, outside the jitted forward

    names = ("encoded", "z_mean", "z_log_var", "decoded")
    # B=300: exercises 300 -> 304 row padding in a single right-sized tile.
    # B=5:   exercises the minimum 8-row tile.
    for B in (300, 5):
        kx, ke = jax.random.fold_in(k_x, B), jax.random.fold_in(k_eps, B)
        x = jax.random.normal(kx, (B, 6), jnp.float32)
        eps = jax.random.normal(ke, (B, 4), jnp.float32)  # reparameterization noise

        outs = vae_forward(x, eps, w_all, b_all)
        outs = jax.block_until_ready(outs)

        refs = vae_ref(x, eps, params)
        for name, o, r in zip(names, outs, refs):
            assert o.shape == r.shape, (B, name, o.shape, r.shape)
            err = float(jnp.max(jnp.abs(o - r)))
            assert jnp.allclose(o, r, atol=1e-5, rtol=1e-5), (B, name, err)

    print("KERNEL_OK")
</pallas_src>

<mosaic_0001>
module attributes {stable_mosaic.version = 11 : i64} {
  func.func @vae_kernel(%arg0: i32, %arg1: memref<304x32xf32, #tpu.memory_space<vmem>>, %arg2: memref<7x32x32xf32, #tpu.memory_space<vmem>>, %arg3: memref<8x32xf32, #tpu.memory_space<vmem>>, %arg4: memref<304x32xf32, #tpu.memory_space<vmem>>) attributes {dimension_semantics = [#tpu.dimension_semantics<parallel>], iteration_bounds = array<i64: 1>, scalar_prefetch = 0 : i64, scratch_operands = 0 : i64, tpu.core_type = #tpu.core_type<tc>, window_params = [{transform_indices = @transform_0, window_bounds = array<i64: 304, 32>}, {pipeline_mode = #tpu.pipeline_mode<synchronous>, transform_indices = @transform_1, window_bounds = array<i64: 7, 32, 32>}, {pipeline_mode = #tpu.pipeline_mode<synchronous>, transform_indices = @transform_2, window_bounds = array<i64: 8, 32>}, {transform_indices = @transform_3, window_bounds = array<i64: 304, 32>}]} {
    %c0 = arith.constant 0 : index
    %c0_0 = arith.constant 0 : index
    %0 = vector.load %arg1[%c0, %c0_0] : memref<304x32xf32, #tpu.memory_space<vmem>>, vector<304x32xf32>
    %c0_1 = arith.constant 0 : index
    %c0_2 = arith.constant 0 : index
    %1 = vector.load %arg3[%c0_1, %c0_2] : memref<8x32xf32, #tpu.memory_space<vmem>>, vector<8x32xf32>
    %2 = tpu.iota {dimensions = array<i32: 1>} : vector<304x32xi32>
    %c0_3 = arith.constant 0 : index
    %c0_4 = arith.constant 0 : index
    %c0_5 = arith.constant 0 : index
    %3 = vector.load %arg2[%c0_3, %c0_4, %c0_5] : memref<7x32x32xf32, #tpu.memory_space<vmem>>, vector<1x32x32xf32>
    %4 = vector.shape_cast %3 : vector<1x32x32xf32> to vector<32x32xf32>
    %cst = arith.constant dense<0.000000e+00> : vector<304x32xf32>
    %5 = tpu.matmul %0, %4, %cst {dimension_numbers = #tpu.dot_dimension_numbers<[1], [0], [0], [1], [0, 0, 1, 1], [], []>} : vector<304x32xf32>, vector<32x32xf32>, vector<304x32xf32> -> vector<304x32xf32>
    %6 = vector.extract_strided_slice %1 {offsets = [0, 0], sizes = [1, 32], strides = [1, 1]} : vector<8x32xf32> to vector<1x32xf32>
    %7 = vector.broadcast %6 : vector<1x32xf32> to vector<304x32xf32>
    %8 = arith.addf %5, %7 : vector<304x32xf32>
    %cst_6 = arith.constant 0.000000e+00 : f32
    %9 = vector.broadcast %cst_6 : f32 to vector<304x32xf32>
    %10 = arith.cmpf ogt, %8, %9 : vector<304x32xf32>
    %cst_7 = arith.constant 0.00999999977 : f32
    %11 = vector.broadcast %cst_7 : f32 to vector<304x32xf32>
    %12 = arith.mulf %11, %8 : vector<304x32xf32>
    %13 = arith.select %10, %8, %12 : vector<304x32xi1>, vector<304x32xf32>
    %c1 = arith.constant 1 : index
    %c0_8 = arith.constant 0 : index
    %c0_9 = arith.constant 0 : index
    %14 = vector.load %arg2[%c1, %c0_8, %c0_9] : memref<7x32x32xf32, #tpu.memory_space<vmem>>, vector<1x32x32xf32>
    %15 = vector.shape_cast %14 : vector<1x32x32xf32> to vector<32x32xf32>
    %cst_10 = arith.constant dense<0.000000e+00> : vector<304x32xf32>
    %16 = tpu.matmul %13, %15, %cst_10 {dimension_numbers = #tpu.dot_dimension_numbers<[1], [0], [0], [1], [0, 0, 1, 1], [], []>} : vector<304x32xf32>, vector<32x32xf32>, vector<304x32xf32> -> vector<304x32xf32>
    %17 = vector.extract_strided_slice %1 {offsets = [1, 0], sizes = [1, 32], strides = [1, 1]} : vector<8x32xf32> to vector<1x32xf32>
    %18 = vector.broadcast %17 : vector<1x32xf32> to vector<304x32xf32>
    %19 = arith.addf %16, %18 : vector<304x32xf32>
    %cst_11 = arith.constant 0.000000e+00 : f32
    %20 = vector.broadcast %cst_11 : f32 to vector<304x32xf32>
    %21 = arith.cmpf ogt, %19, %20 : vector<304x32xf32>
    %cst_12 = arith.constant 0.00999999977 : f32
    %22 = vector.broadcast %cst_12 : f32 to vector<304x32xf32>
    %23 = arith.mulf %22, %19 : vector<304x32xf32>
    %24 = arith.select %21, %19, %23 : vector<304x32xi1>, vector<304x32xf32>
    %c2 = arith.constant 2 : index
    %c0_13 = arith.constant 0 : index
    %c0_14 = arith.constant 0 : index
    %25 = vector.load %arg2[%c2, %c0_13, %c0_14] : memref<7x32x32xf32, #tpu.memory_space<vmem>>, vector<1x32x32xf32>
    %26 = vector.shape_cast %25 : vector<1x32x32xf32> to vector<32x32xf32>
    %cst_15 = arith.constant dense<0.000000e+00> : vector<304x32xf32>
    %27 = tpu.matmul %24, %26, %cst_15 {dimension_numbers = #tpu.dot_dimension_numbers<[1], [0], [0], [1], [0, 0, 1, 1], [], []>} : vector<304x32xf32>, vector<32x32xf32>, vector<304x32xf32> -> vector<304x32xf32>
    %28 = vector.extract_strided_slice %1 {offsets = [2, 0], sizes = [1, 32], strides = [1, 1]} : vector<8x32xf32> to vector<1x32xf32>
    %29 = vector.broadcast %28 : vector<1x32xf32> to vector<304x32xf32>
    %30 = arith.addf %27, %29 : vector<304x32xf32>
    %c3 = arith.constant 3 : index
    %c0_16 = arith.constant 0 : index
    %c0_17 = arith.constant 0 : index
    %31 = vector.load %arg2[%c3, %c0_16, %c0_17] : memref<7x32x32xf32, #tpu.memory_space<vmem>>, vector<1x32x32xf32>
    %32 = vector.shape_cast %31 : vector<1x32x32xf32> to vector<32x32xf32>
    %cst_18 = arith.constant dense<0.000000e+00> : vector<304x32xf32>
    %33 = tpu.matmul %24, %32, %cst_18 {dimension_numbers = #tpu.dot_dimension_numbers<[1], [0], [0], [1], [0, 0, 1, 1], [], []>} : vector<304x32xf32>, vector<32x32xf32>, vector<304x32xf32> -> vector<304x32xf32>
    %34 = vector.extract_strided_slice %1 {offsets = [3, 0], sizes = [1, 32], strides = [1, 1]} : vector<8x32xf32> to vector<1x32xf32>
    %35 = vector.broadcast %34 : vector<1x32xf32> to vector<304x32xf32>
    %36 = arith.addf %33, %35 : vector<304x32xf32>
    %c8_i32 = arith.constant 8 : i32
    %37 = vector.broadcast %c8_i32 : i32 to vector<304x32xi32>
    %38 = arith.cmpi sge, %2, %37 : vector<304x32xi32>
    %c12_i32 = arith.constant 12 : i32
    %39 = vector.broadcast %c12_i32 : i32 to vector<304x32xi32>
    %40 = arith.cmpi slt, %2, %39 : vector<304x32xi32>
    %41 = arith.andi %38, %40 : vector<304x32xi1>
    %cst_19 = arith.constant 0.000000e+00 : f32
    %42 = vector.broadcast %cst_19 : f32 to vector<304x32xf32>
    %43 = arith.select %41, %0, %42 : vector<304x32xi1>, vector<304x32xf32>
    %cst_20 = arith.constant 5.000000e-01 : f32
    %44 = vector.broadcast %cst_20 : f32 to vector<304x32xf32>
    %45 = arith.mulf %36, %44 : vector<304x32xf32>
    %46 = math.exp %45 : vector<304x32xf32>
    %47 = arith.mulf %43, %46 : vector<304x32xf32>
    %48 = arith.addf %30, %47 : vector<304x32xf32>
    %c4 = arith.constant 4 : index
    %c0_21 = arith.constant 0 : index
    %c0_22 = arith.constant 0 : index
    %49 = vector.load %arg2[%c4, %c0_21, %c0_22] : memref<7x32x32xf32, #tpu.memory_space<vmem>>, vector<1x32x32xf32>
    %50 = vector.shape_cast %49 : vector<1x32x32xf32> to vector<32x32xf32>
    %cst_23 = arith.constant dense<0.000000e+00> : vector<304x32xf32>
    %51 = tpu.matmul %48, %50, %cst_23 {dimension_numbers = #tpu.dot_dimension_numbers<[1], [0], [0], [1], [0, 0, 1, 1], [], []>} : vector<304x32xf32>, vector<32x32xf32>, vector<304x32xf32> -> vector<304x32xf32>
    %52 = vector.extract_strided_slice %1 {offsets = [4, 0], sizes = [1, 32], strides = [1, 1]} : vector<8x32xf32> to vector<1x32xf32>
    %53 = vector.broadcast %52 : vector<1x32xf32> to vector<304x32xf32>
    %54 = arith.addf %51, %53 : vector<304x32xf32>
    %cst_24 = arith.constant 0.000000e+00 : f32
    %55 = vector.broadcast %cst_24 : f32 to vector<304x32xf32>
    %56 = arith.maximumf %54, %55 : vector<304x32xf32>
    %c5 = arith.constant 5 : index
    %c0_25 = arith.constant 0 : index
    %c0_26 = arith.constant 0 : index
    %57 = vector.load %arg2[%c5, %c0_25, %c0_26] : memref<7x32x32xf32, #tpu.memory_space<vmem>>, vector<1x32x32xf32>
    %58 = vector.shape_cast %57 : vector<1x32x32xf32> to vector<32x32xf32>
    %cst_27 = arith.constant dense<0.000000e+00> : vector<304x32xf32>
    %59 = tpu.matmul %56, %58, %cst_27 {dimension_numbers = #tpu.dot_dimension_numbers<[1], [0], [0], [1], [0, 0, 1, 1], [], []>} : vector<304x32xf32>, vector<32x32xf32>, vector<304x32xf32> -> vector<304x32xf32>
    %60 = vector.extract_strided_slice %1 {offsets = [5, 0], sizes = [1, 32], strides = [1, 1]} : vector<8x32xf32> to vector<1x32xf32>
    %61 = vector.broadcast %60 : vector<1x32xf32> to vector<304x32xf32>
    %62 = arith.addf %59, %61 : vector<304x32xf32>
    %cst_28 = arith.constant 0.000000e+00 : f32
    %63 = vector.broadcast %cst_28 : f32 to vector<304x32xf32>
    %64 = arith.maximumf %62, %63 : vector<304x32xf32>
    %c6 = arith.constant 6 : index
    %c0_29 = arith.constant 0 : index
    %c0_30 = arith.constant 0 : index
    %65 = vector.load %arg2[%c6, %c0_29, %c0_30] : memref<7x32x32xf32, #tpu.memory_space<vmem>>, vector<1x32x32xf32>
    %66 = vector.shape_cast %65 : vector<1x32x32xf32> to vector<32x32xf32>
    %cst_31 = arith.constant dense<0.000000e+00> : vector<304x32xf32>
    %67 = tpu.matmul %64, %66, %cst_31 {dimension_numbers = #tpu.dot_dimension_numbers<[1], [0], [0], [1], [0, 0, 1, 1], [], []>} : vector<304x32xf32>, vector<32x32xf32>, vector<304x32xf32> -> vector<304x32xf32>
    %68 = vector.extract_strided_slice %1 {offsets = [6, 0], sizes = [1, 32], strides = [1, 1]} : vector<8x32xf32> to vector<1x32xf32>
    %69 = vector.broadcast %68 : vector<1x32xf32> to vector<304x32xf32>
    %70 = arith.addf %67, %69 : vector<304x32xf32>
    %c12_i32_32 = arith.constant 12 : i32
    %71 = vector.broadcast %c12_i32_32 : i32 to vector<304x32xi32>
    %72 = arith.cmpi sge, %2, %71 : vector<304x32xi32>
    %c16_i32 = arith.constant 16 : i32
    %73 = vector.broadcast %c16_i32 : i32 to vector<304x32xi32>
    %74 = arith.cmpi slt, %2, %73 : vector<304x32xi32>
    %75 = arith.andi %72, %74 : vector<304x32xi1>
    %cst_33 = arith.constant 0.000000e+00 : f32
    %76 = vector.broadcast %cst_33 : f32 to vector<304x32xf32>
    %77 = arith.select %75, %36, %76 : vector<304x32xi1>, vector<304x32xf32>
    %78 = arith.addf %48, %77 : vector<304x32xf32>
    %79 = arith.addf %78, %70 : vector<304x32xf32>
    %c0_34 = arith.constant 0 : index
    %c0_35 = arith.constant 0 : index
    %80 = vector.load %arg4[%c0_34, %c0_35] : memref<304x32xf32, #tpu.memory_space<vmem>>, vector<304x32xf32>
    tpu.vector_store %arg4[%c0_34, %c0_35], %79 {strides = array<i32>} : memref<304x32xf32, #tpu.memory_space<vmem>>, vector<304x32xf32>,
    return
  }
  func.func @transform_0(%arg0: i32) -> (i32, i32) {
    %c0_i32 = arith.constant 0 : i32
    %c0_i32_0 = arith.constant 0 : i32
    return %arg0, %c0_i32 : i32, i32
  }
  func.func @transform_1(%arg0: i32) -> (i32, i32, i32) {
    %c0_i32 = arith.constant 0 : i32
    %c0_i32_0 = arith.constant 0 : i32
    %c0_i32_1 = arith.constant 0 : i32
    %c0_i32_2 = arith.constant 0 : i32
    return %c0_i32, %c0_i32_0, %c0_i32_1 : i32, i32, i32
  }
  func.func @transform_2(%arg0: i32) -> (i32, i32) {
    %c0_i32 = arith.constant 0 : i32
    %c0_i32_0 = arith.constant 0 : i32
    %c0_i32_1 = arith.constant 0 : i32
    return %c0_i32, %c0_i32_0 : i32, i32
  }
  func.func @transform_3(%arg0: i32) -> (i32, i32) {
    %c0_i32 = arith.constant 0 : i32
    %c0_i32_0 = arith.constant 0 : i32
    return %arg0, %c0_i32 : i32, i32
  }
}

</mosaic_0001>

<bundles_post_ra>
// kernel: vae_forward.1
= control target key start
LH: loop header
LB: loop body
LE: loop exit
PB: predicated region body
PF: predicated region fallthrough
CT: control target
= control target key end

     0   :  { %vm63_vm0 = vcmask 261120   ;;  %v53_v7 = vlaneseq  ;;  %s6406_s1 = inlined_call_operand.vmem [shape: f32[7,32,32], index: 1, kind: input, shape index: {}]   ;;  %s6407_s0 = inlined_call_operand.vmem [shape: f32[304,32], index: 0, kind: input, shape index: {}]   ;;  %s6408_s2 = inlined_call_operand.vmem [shape: f32[8,32], index: 2, kind: input, shape index: {}]   ;;  %s6409_s3 = inlined_call_operand.vmem [shape: f32[304,32], index: 3, kind: output, shape index: {}]  }
   0x1   :  { %v55_v0 = vld [vmem:[%s6406_s1] sm:$0xff]  ;;  %v56_v1 = vld [vmem:[%s6406_s1 + $0x8] sm:$0xff]  ;;  %v57_v2 = vld [vmem:[%s6406_s1 + $0x10] sm:$0xff] }
   0x2   :  { %v4320_v3 = vpack.c.bf16 %v56_v1, %v55_v0  ;;  %v58_v4 = vld [vmem:[%s6406_s1 + $0x18] sm:$0xff]  ;;  %v14_v5 = vld [vmem:[%s6407_s0] sm:$0xff]  ;;  %v4524_v8 = vand.u32 127, %v53_v7  ;;  %v15_v9 = vld [vmem:[%s6407_s0 + $0x8] sm:$0xff] }
   0x3   :  { %v4324_v6 = vpack.c.bf16 %v58_v4, %v57_v2  ;;  %3873 = vmatprep.mubr.msk.f32.mxu0 %vm63_vm0, %v14_v5  ;;  %v16_v10 = vld [vmem:[%s6407_s0 + $0x10] sm:$0xff]  ;;  %v34_v11 = vld [vmem:[%s6407_s0 + $0xa0] sm:$0xff]  ;;  %v35_v12 = vld [vmem:[%s6407_s0 + $0xa8] sm:$0xff]  ;;  %v4759_v4 = vshrl.u32 %v53_v7, 7 }
   0x4   :  { %4321 = vmatprep.subr.bf16.mxu0 %v4320_v3  ;;  %4376 = vmatprep.subr.bf16.mxu1 %v4320_v3  ;;  %vm1681_vm1 = vcmp.ge.s32.totalorder %v4524_v8, 8  ;;  %vm1682_vm2 = vcmp.lt.s32.totalorder %v4524_v8, 12  ;;  %v36_v13 = vld [vmem:[%s6407_s0 + $0xb0] sm:$0xff]  ;;  %v17_v15 = vld [vmem:[%s6407_s0 + $0x18] sm:$0xff]  ;;  %v18_v16 = vld [vmem:[%s6407_s0 + $0x20] sm:$0xff] }
   0x5   :  { %4323 = vmatpush3.bf16.msra.mxu0 %v4320_v3  ;;  %4378 = vmatpush3.bf16.msra.mxu1 %v4320_v3  ;;  %vm4544_vm3 = vmand %vm1681_vm1, %vm1682_vm2  ;;  %v37_v17 = vld [vmem:[%s6407_s0 + $0xb8] sm:$0xff]  ;;  %v38_v18 = vld [vmem:[%s6407_s0 + $0xc0] sm:$0xff]  ;;  %6434 = vst [vmem:[#allocation11_spill] sm:$0xff] %v4759_v4  ;;  %v61_v5 = vsub.s32 0, %v4759_v4  ;;  %v1046_v31 = vsub.s32 2, %v4759_v4 }
   0x6   :  { %4325 = vmatprep.subr.bf16.mxu0 %v4324_v6  ;;  %4377 = vmatprep.subr.bf16.mxu1 %v4324_v6  ;;  %v4567_v19 = vld [vmem:[%s6407_s0 + $0xe8] sm:$0xff]  ;;  %v4575_v21 = vld [vmem:[%s6407_s0 + $0xf0] sm:$0xff]  ;;  %v4580_v22 = vld [vmem:[%s6407_s0 + $0xf8] sm:$0xff] }
   0x7   :  { %3903 = vmatprep.mubr.msk.f32.mxu1 %vm63_vm0, %v34_v11  ;;  %6425 = vst [vmem:[#allocation2_spill] sm:$0xff] %v4567_v19  ;;  %6426 = vst [vmem:[#allocation3_spill] sm:$0xff] %v4575_v21  ;;  %v4585_v23 = vld [vmem:[%s6407_s0 + $0x100] sm:$0xff]  ;;  %v4599_v27 = vld [vmem:[%s6407_s0 + $0x108] sm:$0xff] }
   0x8   :  { %6427 = vst [vmem:[#allocation4_spill] sm:$0xff] %v4580_v22  ;;  %6428 = vst [vmem:[#allocation5_spill] sm:$0xff] %v4585_v23  ;;  %v4604_v28 = vld [vmem:[%s6407_s0 + $0x110] sm:$0xff]  ;;  %v4609_v29 = vld [vmem:[%s6407_s0 + $0x118] sm:$0xff] }
   0x9   :  { %4327 = vmatpush3.bf16.msra.mxu0 %v4324_v6  ;;  %4379 = vmatpush3.bf16.msra.mxu1 %v4324_v6  ;;  %6429 = vst [vmem:[#allocation6_spill] sm:$0xff] %v4599_v27  ;;  %6430 = vst [vmem:[#allocation7_spill] sm:$0xff] %v4604_v28  ;;  %v4625_v33 = vld [vmem:[%s6407_s0 + $0x120] sm:$0xff]  ;;  %v4630_v34 = vld [vmem:[%s6407_s0 + $0x128] sm:$0xff] }
   0xa   :  { %6431 = vst [vmem:[#allocation8_spill] sm:$0xff] %v4609_v29  ;;  %6432 = vst [vmem:[#allocation9_spill] sm:$0xff] %v4625_v33  ;;  %v3319_v35 = vld [vmem:[%s6406_s1 + $0x20] sm:$0xff]  ;;  %v19_v36 = vld [vmem:[%s6407_s0 + $0x28] sm:$0xff] }
   0xb   :  { %6433 = vst [vmem:[#allocation10_spill] sm:$0xff] %v4630_v34  ;;  %v39_v37 = vld [vmem:[%s6407_s0 + $0xc8] sm:$0xff]  ;;  %v20_v41 = vld [vmem:[%s6407_s0 + $0x30] sm:$0xff]  ;;  %v3322_v45 = vld [vmem:[%s6406_s1 + $0x38] sm:$0xff] }
   0xc   :  { %3874 = vmatmul.mubr.msk.f32.vlgmr.msra.gmra.mrb[0].mxu0 %vm63_vm0, %v15_v9  ;;  %3904 = vmatmul.mubr.msk.f32.vlgmr.msra.gmra.mrb[0].mxu1 %vm63_vm0, %v35_v12  ;;  %v3320_v40 = vld [vmem:[%s6406_s1 + $0x28] sm:$0xff]  ;;  %v40_v42 = vld [vmem:[%s6407_s0 + $0xd0] sm:$0xff]  ;;  %v21_v46 = vld [vmem:[%s6407_s0 + $0x38] sm:$0xff] }
   0xd   :  { %3876 = vmatprep.mubr.msk.f32.mxu0 %vm63_vm0, %v16_v10  ;;  %3906 = vmatprep.mubr.msk.f32.mxu1 %vm63_vm0, %v36_v13  ;;  %v4328_v43 = vpack.c.bf16 %v3320_v40, %v3319_v35  ;;  %v3321_v44 = vld [vmem:[%s6406_s1 + $0x30] sm:$0xff]  ;;  %v41_v47 = vld [vmem:[%s6407_s0 + $0xd8] sm:$0xff]  ;;  %v22_v48 = vld [vmem:[%s6407_s0 + $0x40] sm:$0xff] }
   0xe   :  { %v42_v49 = vld [vmem:[%s6407_s0 + $0xe0] sm:$0xff]  ;;  %v4332_v50 = vpack.c.bf16 %v3322_v45, %v3321_v44  ;;  %v23_v51 = vld [vmem:[%s6407_s0 + $0x48] sm:$0xff]  ;;  %v24_v52 = vld [vmem:[%s6407_s0 + $0x50] sm:$0xff] }
   0xf   :  { %4329 = vmatprep.subr.bf16.mxu1 %v4328_v43  ;;  %v25_v53 = vld [vmem:[%s6407_s0 + $0x58] sm:$0xff]  ;;  %v26_v54 = vld [vmem:[%s6407_s0 + $0x60] sm:$0xff]  ;;  %v27_v55 = vld [vmem:[%s6407_s0 + $0x68] sm:$0xff] }
  0x10   :  { %3877 = vmatmul.mubr.msk.f32.gmra.mrb[2].mxu0 %vm63_vm0, %v17_v15  ;;  %3907 = vmatmul.mubr.msk.f32.gmra.mrb[2].mxu1 %vm63_vm0, %v37_v17  ;;  %v28_v56 = vld [vmem:[%s6407_s0 + $0x70] sm:$0xff]  ;;  %v29_v57 = vld [vmem:[%s6407_s0 + $0x78] sm:$0xff]  ;;  %v30_v58 = vld [vmem:[%s6407_s0 + $0x80] sm:$0xff] }
  0x11   :  { %3879 = vmatprep.mubr.msk.f32.mxu0 %vm63_vm0, %v18_v16  ;;  %3909 = vmatprep.mubr.msk.f32.mxu1 %vm63_vm0, %v38_v18  ;;  %v31_v59 = vld [vmem:[%s6407_s0 + $0x88] sm:$0xff]  ;;  %v32_v60 = vld [vmem:[%s6407_s0 + $0x90] sm:$0xff]  ;;  %v33_v61 = vld [vmem:[%s6407_s0 + $0x98] sm:$0xff] }
  0x12   :  { %4331 = vmatpush3.bf16.msra.mxu1 %v4328_v43  ;;  %v3403_v62 = vld [vmem:[%s6406_s1 + $0x60] sm:$0xff]  ;;  %v3404_v63 = vld [vmem:[%s6406_s1 + $0x68] sm:$0xff]  ;;  %v3405_v17 = vld [vmem:[%s6406_s1 + $0x70] sm:$0xff] }
  0x13   :  { %4333 = vmatprep.subr.bf16.mxu1 %v4332_v50  ;;  %v4344_v0 = vpack.c.bf16 %v3404_v63, %v3403_v62  ;;  %v3361_v1 = vld [vmem:[%s6406_s1 + $0x40] sm:$0xff]  ;;  %v3362_v2 = vld [vmem:[%s6406_s1 + $0x48] sm:$0xff]  ;;  %v3406_v18 = vld [vmem:[%s6406_s1 + $0x78] sm:$0xff] }
  0x14   :  { %3880 = vmatmul.mubr.msk.f32.gmra.mrb[4].mxu0 %vm63_vm0, %v19_v36  ;;  %3910 = vmatmul.mubr.msk.f32.gmra.mrb[4].mxu1 %vm63_vm0, %v39_v37  ;;  %v4336_v3 = vpack.c.bf16 %v3362_v2, %v3361_v1  ;;  %v4765_v6 = vld [vmem:[%s6408_s2] sm:$0xff]  ;;  %v4348_v45 = vpack.c.bf16 %v3406_v18, %v3405_v17  ;;  %v5220_v38 = vld [vmem:[%s6407_s0 + $0x78] sm:$0xff]  ;;  %v5240_v25 = vld [vmem:[%s6407_s0 + $0x88] sm:$0xff] }
  0x15   :  { %3882 = vmatprep.mubr.msk.f32.mxu0 %vm63_vm0, %v20_v41  ;;  %3912 = vmatprep.mubr.msk.f32.mxu1 %vm63_vm0, %v40_v42  ;;  %v4768_v9 = vrot.slane %v4765_v6, %v61_v5  ;;  %v5253_v24 = vld [vmem:[%s6407_s0 + $0x90] sm:$0xff]  ;;  %v3529_v14 = vld [vmem:[%s6406_s1 + $0xc0] sm:$0xff] }
  0x16   :  { %4335 = vmatpush3.bf16.msra.mxu1 %v4332_v50  ;;  %4337 = vmatprep.subr.bf16.mxu0 %v4336_v3 }
  0x17   :  { %4345 = vmatprep.subr.bf16.mxu1 %v4344_v0  ;;  %4339 = vmatpush3.bf16.msra.mxu0 %v4336_v3 }
  0x18   :  { %3883 = vmatmul.mubr.msk.f32.gmra.mrb[6].mxu0 %vm63_vm0, %v21_v46  ;;  %3913 = vmatmul.mubr.msk.f32.gmra.mrb[6].mxu1 %vm63_vm0, %v41_v47 }
  0x19   :  { %3885 = vmatprep.mubr.msk.f32.mxu0 %vm63_vm0, %v22_v48  ;;  %3915 = vmatprep.mubr.msk.f32.mxu1 %vm63_vm0, %v42_v49 }
  0x1c   :  { %3886 = vmatmul.mubr.msk.f32.gmra.mrb[8].mxu0 %vm63_vm0, %v23_v51  ;;  %3916 = vmatmul.mubr.msk.f32.gmra.mrb[8].mxu1 %vm63_vm0, %v4567_v19 }
  0x1d   :  { %3888 = vmatprep.mubr.msk.f32.mxu0 %vm63_vm0, %v24_v52  ;;  %3918 = vmatprep.mubr.msk.f32.mxu1 %vm63_vm0, %v4575_v21 }
  0x20   :  { %3889 = vmatmul.mubr.msk.f32.gmra.mrb[10].mxu0 %vm63_vm0, %v25_v53  ;;  %3919 = vmatmul.mubr.msk.f32.gmra.mrb[10].mxu1 %vm63_vm0, %v4580_v22 }
  0x21   :  { %3891 = vmatprep.mubr.msk.f32.mxu0 %vm63_vm0, %v26_v54  ;;  %3921 = vmatprep.mubr.msk.f32.mxu1 %vm63_vm0, %v4585_v23 }
  0x24   :  { %3892 = vmatmul.mubr.msk.f32.gmra.mrb[12].mxu0 %vm63_vm0, %v27_v55  ;;  %3922 = vmatmul.mubr.msk.f32.gmra.mrb[12].mxu1 %vm63_vm0, %v4599_v27 }
  0x25   :  { %3894 = vmatprep.mubr.msk.f32.mxu0 %vm63_vm0, %v28_v56  ;;  %3924 = vmatprep.mubr.msk.f32.mxu1 %vm63_vm0, %v4604_v28 }
  0x28   :  { %3895 = vmatmul.mubr.msk.f32.gmra.mrb[14].mxu0 %vm63_vm0, %v29_v57  ;;  %3925 = vmatmul.mubr.msk.f32.gmra.mrb[14].mxu1 %vm63_vm0, %v4609_v29 }
  0x29   :  { %3897 = vmatprep.mubr.msk.f32.mxu0 %vm63_vm0, %v30_v58  ;;  %3927 = vmatprep.mubr.msk.f32.mxu1 %vm63_vm0, %v4625_v33 }
  0x2c   :  { %3898 = vmatmul.mubr.msk.f32.gmra.mrb[16].mxu0 %vm63_vm0, %v31_v59  ;;  %3928 = vmatmul.mubr.msk.f32.gmra.mrb[16].mxu1 %vm63_vm0, %v4630_v34 }
  0x2d   :  { %3900 = vmatprep.mubr.msk.f32.mxu0 %vm63_vm0, %v32_v60 }
  0x30   :  { %3901 = vmatmul.mubr.msk.f32.gmra.mrb[18].mxu0 %vm63_vm0, %v33_v61 }
  0xdf   :  { %v3875_v10 = vpop.f32.mrb[0].mxu0  ;;  %v4770_v11 = vpop.f32.mrb[0].mxu1 }
  0xe0   :  { %v250_v12 = vadd.f32 %v3875_v10, %v4768_v9  ;;  %v244_v13 = vpop.f32.mrb[1].mxu0  ;;  %v4773_v15 = vpop.f32.mrb[1].mxu1 }
  0xe1   :  { %v245_v7 = vadd.f32 %v244_v13, %v4768_v9 }
  0xe2   :  { %v472_v16 = vmul.f32 0.01, %v250_v12  ;;  %vm434_vm4 = vcmp.gt.f32.partialorder %v250_v12, 0.0 }
  0xe3   :  { %vm433_vm5 = vcmp.gt.f32.partialorder %v245_v7, 0.0  ;;  %v471_v35 = vmul.f32 0.01, %v245_v7  ;;  %v3878_v36 = vpop.f32.mrb[2].mxu0  ;;  %v4782_v37 = vpop.f32.mrb[2].mxu1 }
  0xe4   :  { %v260_v40 = vadd.f32 %v3878_v36, %v4768_v9  ;;  %v254_v41 = vpop.f32.mrb[3].mxu0  ;;  %v4785_v42 = vpop.f32.mrb[3].mxu1  ;;  %v510_v46 = vsel %vm434_vm4, %v250_v12, %v472_v16 }
  0xe5   :  { %v255_v43 = vadd.f32 %v254_v41, %v4768_v9  ;;  %v509_v44 = vsel %vm433_vm5, %v245_v7, %v471_v35 }
  0xe6   :  { %v474_v47 = vmul.f32 0.01, %v260_v40  ;;  %3938 = vmatprep.mubr.msk.f32.mxu1 %vm63_vm0, %v509_v44  ;;  %vm436_vm6 = vcmp.gt.f32.partialorder %v260_v40, 0.0 }
  0xe7   :  { %vm435_vm7 = vcmp.gt.f32.partialorder %v255_v43, 0.0  ;;  %v473_v48 = vmul.f32 0.01, %v255_v43  ;;  %v3881_v49 = vpop.f32.mrb[4].mxu0  ;;  %3939 = vmatmul.mubr.msk.f32.vlgmr.msra.gmra.mrb[18].mxu1 %vm63_vm0, %v510_v46  ;;  %v4790_v50 = vpop.f32.mrb[4].mxu1 }
  0xe8   :  { %v270_v51 = vadd.f32 %v3881_v49, %v4768_v9  ;;  %v264_v52 = vpop.f32.mrb[5].mxu0  ;;  %v4793_v53 = vpop.f32.mrb[5].mxu1  ;;  %4347 = vmatpush3.bf16.msra.mxu1 %v4344_v0  ;;  %v512_v57 = vsel %vm436_vm6, %v260_v40, %v474_v47 }
  0xe9   :  { %v265_v54 = vadd.f32 %v264_v52, %v4768_v9  ;;  %v511_v55 = vsel %vm435_vm7, %v255_v43, %v473_v48  ;;  %4349 = vmatprep.subr.bf16.mxu1 %v4348_v45 }
  0xea   :  { %v476_v56 = vmul.f32 0.01, %v270_v51  ;;  %3941 = vmatprep.mubr.msk.f32.mxu1 %vm63_vm0, %v511_v55  ;;  %vm438_vm8 = vcmp.gt.f32.partialorder %v270_v51, 0.0 }
  0xeb   :  { %vm437_vm9 = vcmp.gt.f32.partialorder %v265_v54, 0.0  ;;  %v475_v58 = vmul.f32 0.01, %v265_v54  ;;  %v3884_v59 = vpop.f32.mrb[6].mxu0  ;;  %3942 = vmatmul.mubr.msk.f32.gmra.mrb[20].mxu1 %vm63_vm0, %v512_v57  ;;  %v4798_v60 = vpop.f32.mrb[6].mxu1 }
  0xec   :  { %v280_v61 = vadd.f32 %v3884_v59, %v4768_v9  ;;  %v274_v62 = vpop.f32.mrb[7].mxu0  ;;  %v4801_v63 = vpop.f32.mrb[7].mxu1  ;;  %4351 = vmatpush3.bf16.msra.mxu1 %v4348_v45  ;;  %v514_v3 = vsel %vm438_vm8, %v270_v51, %v476_v56 }
  0xed   :  { %v275_v0 = vadd.f32 %v274_v62, %v4768_v9  ;;  %v513_v1 = vsel %vm437_vm9, %v265_v54, %v475_v58 }
  0xee   :  { %v478_v2 = vmul.f32 0.01, %v280_v61  ;;  %3944 = vmatprep.mubr.msk.f32.mxu1 %vm63_vm0, %v513_v1  ;;  %vm440_vm10 = vcmp.gt.f32.partialorder %v280_v61, 0.0 }
  0xef   :  { %vm439_vm11 = vcmp.gt.f32.partialorder %v275_v0, 0.0  ;;  %v477_v5 = vmul.f32 0.01, %v275_v0  ;;  %v3887_v10 = vpop.f32.mrb[8].mxu0  ;;  %3945 = vmatmul.mubr.msk.f32.gmra.mrb[22].mxu1 %vm63_vm0, %v514_v3  ;;  %v4806_v12 = vpop.f32.mrb[8].mxu1 }
  0xf0   :  { %v290_v13 = vadd.f32 %v3887_v10, %v4768_v9  ;;  %v284_v7 = vpop.f32.mrb[9].mxu0  ;;  %v4809_v16 = vpop.f32.mrb[9].mxu1  ;;  %v516_v36 = vsel %vm440_vm10, %v280_v61, %v478_v2 }
  0xf1   :  { %v285_v17 = vadd.f32 %v284_v7, %v4768_v9  ;;  %v515_v18 = vsel %vm439_vm11, %v275_v0, %v477_v5 }
  0xf2   :  { %v480_v35 = vmul.f32 0.01, %v290_v13  ;;  %3947 = vmatprep.mubr.msk.f32.mxu1 %vm63_vm0, %v515_v18  ;;  %vm442_vm12 = vcmp.gt.f32.partialorder %v290_v13, 0.0 }
  0xf3   :  { %vm441_vm13 = vcmp.gt.f32.partialorder %v285_v17, 0.0  ;;  %v479_v40 = vmul.f32 0.01, %v285_v17  ;;  %v3890_v41 = vpop.f32.mrb[10].mxu0  ;;  %3948 = vmatmul.mubr.msk.f32.gmra.mrb[24].mxu1 %vm63_vm0, %v516_v36  ;;  %v4814_v43 = vpop.f32.mrb[10].mxu1 }
  0xf4   :  { %v300_v44 = vadd.f32 %v3890_v41, %v4768_v9  ;;  %v294_v45 = vpop.f32.mrb[11].mxu0  ;;  %v4817_v46 = vpop.f32.mrb[11].mxu1  ;;  %v518_v51 = vsel %vm442_vm12, %v290_v13, %v480_v35 }
  0xf5   :  { %v295_v47 = vadd.f32 %v294_v45, %v4768_v9  ;;  %v517_v48 = vsel %vm441_vm13, %v285_v17, %v479_v40 }
  0xf6   :  { %v482_v49 = vmul.f32 0.01, %v300_v44  ;;  %3950 = vmatprep.mubr.msk.f32.mxu1 %vm63_vm0, %v517_v48  ;;  %vm444_vm14 = vcmp.gt.f32.partialorder %v300_v44, 0.0 }
  0xf7   :  { %vm443_vm15 = vcmp.gt.f32.partialorder %v295_v47, 0.0  ;;  %v481_v52 = vmul.f32 0.01, %v295_v47  ;;  %v3893_v54 = vpop.f32.mrb[12].mxu0  ;;  %3951 = vmatmul.mubr.msk.f32.gmra.mrb[26].mxu1 %vm63_vm0, %v518_v51  ;;  %v3923_v55 = vpop.f32.mrb[12].mxu1 }
  0xf8   :  { %v310_v56 = vadd.f32 %v3893_v54, %v4768_v9  ;;  %v304_v57 = vpop.f32.mrb[13].mxu0  ;;  %v4824_v58 = vadd.f32 %v3923_v55, %v4768_v9  ;;  %v4826_v59 = vpop.f32.mrb[13].mxu1  ;;  %v520_v1 = vsel %vm444_vm14, %v300_v44, %v482_v49 }
  0xf9   :  { %v305_v61 = vadd.f32 %v304_v57, %v4768_v9  ;;  %v519_v62 = vsel %vm443_vm15, %v295_v47, %v481_v52 }
  0xfa   :  { %v484_v0 = vmul.f32 0.01, %v310_v56  ;;  %3953 = vmatprep.mubr.msk.f32.mxu1 %vm63_vm0, %v519_v62  ;;  %vm446_vm1 = vcmp.gt.f32.partialorder %v310_v56, 0.0 }
  0xfb   :  { %vm445_vm2 = vcmp.gt.f32.partialorder %v305_v61, 0.0  ;;  %v483_v2 = vmul.f32 0.01, %v305_v61  ;;  %v3896_v3 = vpop.f32.mrb[14].mxu0  ;;  %3954 = vmatmul.mubr.msk.f32.gmra.mrb[28].mxu1 %vm63_vm0, %v520_v1  ;;  %v3926_v5 = vpop.f32.mrb[14].mxu1 }
  0xfc   :  { %v320_v10 = vadd.f32 %v3896_v3, %v4768_v9  ;;  %v314_v13 = vpop.f32.mrb[15].mxu0  ;;  %v4833_v7 = vadd.f32 %v3926_v5, %v4768_v9  ;;  %v414_v17 = vpop.f32.mrb[15].mxu1  ;;  %v522_v41 = vsel %vm446_vm1, %v310_v56, %v484_v0  ;;  %v345_v56 = vadd.f32 %v4773_v15, %v4768_v9 }
  0xfd   :  { %v315_v18 = vadd.f32 %v314_v13, %v4768_v9  ;;  %v521_v35 = vsel %vm445_vm2, %v305_v61, %v483_v2  ;;  %v4837_v36 = vadd.f32 %v414_v17, %v4768_v9  ;;  %v355_v17 = vadd.f32 %v4785_v42, %v4768_v9 }
  0xfe   :  { %v486_v40 = vmul.f32 0.01, %v320_v10  ;;  %3956 = vmatprep.mubr.msk.f32.mxu1 %vm63_vm0, %v521_v35  ;;  %vm448_vm4 = vcmp.gt.f32.partialorder %v320_v10, 0.0  ;;  %v491_v15 = vmul.f32 0.01, %v345_v56  ;;  %vm453_vm8 = vcmp.gt.f32.partialorder %v345_v56, 0.0 }
  0xff   :  { %vm447_vm5 = vcmp.gt.f32.partialorder %v315_v18, 0.0  ;;  %v485_v44 = vmul.f32 0.01, %v315_v18  ;;  %v3899_v45 = vpop.f32.mrb[16].mxu0  ;;  %3957 = vmatmul.mubr.msk.f32.gmra.mrb[30].mxu1 %vm63_vm0, %v522_v41  ;;  %v3929_v47 = vpop.f32.mrb[16].mxu1  ;;  %vm455_vm11 = vcmp.gt.f32.partialorder %v355_v17, 0.0 }
 0x100   :  { %v330_v48 = vadd.f32 %v3899_v45, %v4768_v9  ;;  %v324_v49 = vpop.f32.mrb[17].mxu0  ;;  %v4843_v51 = vadd.f32 %v3929_v47, %v4768_v9  ;;  %v424_v52 = vpop.f32.mrb[17].mxu1  ;;  %v524_v62 = vsel %vm448_vm4, %v320_v10, %v486_v40  ;;  %v350_v10 = vadd.f32 %v4770_v11, %v4768_v9 }
 0x101   :  { %v325_v54 = vadd.f32 %v324_v49, %v4768_v9  ;;  %v523_v55 = vsel %vm447_vm5, %v315_v18, %v485_v44  ;;  %v4849_v57 = vadd.f32 %v424_v52, %v4768_v9  ;;  %v493_v41 = vmul.f32 0.01, %v355_v17 }
 0x102   :  { %v488_v61 = vmul.f32 0.01, %v330_v48  ;;  %3959 = vmatprep.mubr.msk.f32.mxu1 %vm63_vm0, %v523_v55  ;;  %vm450_vm6 = vcmp.gt.f32.partialorder %v330_v48, 0.0  ;;  %v529_v45 = vsel %vm453_vm8, %v345_v56, %v491_v15  ;;  %v365_v47 = vadd.f32 %v4793_v53, %v4768_v9 }
 0x103   :  { %vm449_vm7 = vcmp.gt.f32.partialorder %v325_v54, 0.0  ;;  %v487_v0 = vmul.f32 0.01, %v325_v54  ;;  %v3902_v1 = vpop.f32.mrb[18].mxu0  ;;  %3960 = vmatmul.mubr.msk.f32.gmra.mrb[32].mxu1 %vm63_vm0, %v524_v62  ;;  %v492_v42 = vmul.f32 0.01, %v350_v10  ;;  %v360_v49 = vadd.f32 %v4782_v37, %v4768_v9 }
 0x104   :  { %v340_v2 = vadd.f32 %v3902_v1, %v4768_v9  ;;  %v334_v3 = vpop.f32.mrb[19].mxu0  ;;  %v526_v35 = vsel %vm450_vm6, %v330_v48, %v488_v61  ;;  %vm454_vm12 = vcmp.gt.f32.partialorder %v350_v10, 0.0  ;;  %v495_v48 = vmul.f32 0.01, %v365_v47 }
 0x105   :  { %v335_v5 = vadd.f32 %v334_v3, %v4768_v9  ;;  %v525_v13 = vsel %vm449_vm7, %v325_v54, %v487_v0  ;;  %v531_v52 = vsel %vm455_vm11, %v355_v17, %v493_v41  ;;  %v375_v54 = vadd.f32 %v4801_v63, %v4768_v9 }
 0x106   :  { %v490_v18 = vmul.f32 0.01, %v340_v2  ;;  %3962 = vmatprep.mubr.msk.f32.mxu1 %vm63_vm0, %v525_v13  ;;  %vm452_vm9 = vcmp.gt.f32.partialorder %v340_v2, 0.0  ;;  %v494_v55 = vmul.f32 0.01, %v360_v49  ;;  %v370_v53 = vadd.f32 %v4790_v50, %v4768_v9 }
 0x107   :  { %vm451_vm10 = vcmp.gt.f32.partialorder %v335_v5, 0.0  ;;  %v489_v40 = vmul.f32 0.01, %v335_v5  ;;  %3963 = vmatmul.mubr.msk.f32.gmra.mrb[34].mxu1 %vm63_vm0, %v526_v35  ;;  %vm457_vm13 = vcmp.gt.f32.partialorder %v365_v47, 0.0  ;;  %v530_v37 = vsel %vm454_vm12, %v350_v10, %v492_v42 }
 0x108   :  { %v528_v11 = vsel %vm452_vm9, %v340_v2, %v490_v18  ;;  %vm456_vm14 = vcmp.gt.f32.partialorder %v360_v49, 0.0  ;;  %v497_v56 = vmul.f32 0.01, %v375_v54  ;;  %v533_v61 = vsel %vm457_vm13, %v365_v47, %v495_v48 }
 0x109   :  { %v527_v44 = vsel %vm451_vm10, %v335_v5, %v489_v40  ;;  %v385_v62 = vadd.f32 %v4809_v16, %v4768_v9  ;;  %v496_v0 = vmul.f32 0.01, %v370_v53  ;;  %v380_v63 = vadd.f32 %v4798_v60, %v4768_v9 }
 0x10a   :  { %3965 = vmatprep.mubr.msk.f32.mxu1 %vm63_vm0, %v527_v44  ;;  %vm459_vm15 = vcmp.gt.f32.partialorder %v375_v54, 0.0  ;;  %v532_v1 = vsel %vm456_vm14, %v360_v49, %v494_v55  ;;  %vm458_vm1 = vcmp.gt.f32.partialorder %v370_v53, 0.0  ;;  %v395_v3 = vadd.f32 %v4817_v46, %v4768_v9 }
 0x10b   :  { %3966 = vmatmul.mubr.msk.f32.gmra.mrb[36].mxu1 %vm63_vm0, %v528_v11  ;;  %v499_v50 = vmul.f32 0.01, %v385_v62  ;;  %v535_v2 = vsel %vm459_vm15, %v375_v54, %v497_v56  ;;  %v498_v5 = vmul.f32 0.01, %v380_v63  ;;  %v390_v16 = vadd.f32 %v4806_v12, %v4768_v9 }
 0x10c   :  { %3968 = vmatprep.mubr.msk.f32.mxu1 %vm63_vm0, %v529_v45  ;;  %vm461_vm2 = vcmp.gt.f32.partialorder %v385_v62, 0.0  ;;  %v534_v15 = vsel %vm458_vm1, %v370_v53, %v496_v0  ;;  %vm460_vm4 = vcmp.gt.f32.partialorder %v380_v63, 0.0  ;;  %v501_v60 = vmul.f32 0.01, %v395_v3 }
 0x10d   :  { %v537_v13 = vsel %vm461_vm2, %v385_v62, %v499_v50  ;;  %v405_v17 = vadd.f32 %v4826_v59, %v4768_v9  ;;  %v500_v18 = vmul.f32 0.01, %v390_v16  ;;  %v400_v46 = vadd.f32 %v4814_v43, %v4768_v9  ;;  %v3448_v50 = vld [vmem:[%s6406_s1 + $0x98] sm:$0xff] }
 0x10e   :  { %vm463_vm5 = vcmp.gt.f32.partialorder %v395_v3, 0.0  ;;  %v536_v10 = vsel %vm460_vm4, %v380_v63, %v498_v5  ;;  %vm462_vm6 = vcmp.gt.f32.partialorder %v390_v16, 0.0  ;;  %v505_v59 = vmul.f32 0.01, %v4837_v36 }
 0x10f   :  { %3969 = vmatmul.mubr.msk.f32.gmra.mrb[38].mxu1 %vm63_vm0, %v530_v37  ;;  %v503_v12 = vmul.f32 0.01, %v405_v17  ;;  %v539_v35 = vsel %vm463_vm5, %v395_v3, %v501_v60  ;;  %v502_v40 = vmul.f32 0.01, %v400_v46  ;;  %vm465_vm7 = vcmp.gt.f32.partialorder %v405_v17, 0.0 }
 0x110   :  { %3971 = vmatprep.mubr.msk.f32.mxu1 %vm63_vm0, %v531_v52  ;;  %v538_v41 = vsel %vm462_vm6, %v390_v16, %v500_v18  ;;  %vm464_vm8 = vcmp.gt.f32.partialorder %v400_v46, 0.0  ;;  %v504_v43 = vmul.f32 0.01, %v4824_v58  ;;  %vm467_vm9 = vcmp.gt.f32.partialorder %v4837_v36, 0.0 }
 0x111   :  { %v541_v9 = vsel %vm465_vm7, %v405_v17, %v503_v12  ;;  %v540_v44 = vsel %vm464_vm8, %v400_v46, %v502_v40  ;;  %vm466_vm10 = vcmp.gt.f32.partialorder %v4824_v58, 0.0  ;;  %v507_v45 = vmul.f32 0.01, %v4849_v57 }
 0x112   :  { %v543_v47 = vsel %vm467_vm9, %v4837_v36, %v505_v59  ;;  %v506_v42 = vmul.f32 0.01, %v4833_v7  ;;  %vm469_vm11 = vcmp.gt.f32.partialorder %v4849_v57, 0.0  ;;  %v542_v49 = vsel %vm466_vm10, %v4824_v58, %v504_v43  ;;  %v3363_v36 = vld [vmem:[%s6406_s1 + $0x50] sm:$0xff] }
 0x113   :  { %3972 = vmatmul.mubr.msk.f32.gmra.mrb[40].mxu1 %vm63_vm0, %v532_v1  ;;  %vm468_vm12 = vcmp.gt.f32.partialorder %v4833_v7, 0.0  ;;  %v545_v11 = vsel %vm469_vm11, %v4849_v57, %v507_v45  ;;  %v508_v48 = vmul.f32 0.01, %v4843_v51  ;;  %vm470_vm13 = vcmp.gt.f32.partialorder %v4843_v51, 0.0  ;;  %v3364_v57 = vld [vmem:[%s6406_s1 + $0x58] sm:$0xff]  ;;  %v3447_v1 = vld [vmem:[%s6406_s1 + $0x90] sm:$0xff] }
 0x114   :  { %3974 = vmatprep.mubr.msk.f32.mxu1 %vm63_vm0, %v533_v61  ;;  %v544_v52 = vsel %vm468_vm12, %v4833_v7, %v506_v42  ;;  %v4340_v54 = vpack.c.bf16 %v3364_v57, %v3363_v36  ;;  %v3445_v7 = vld [vmem:[%s6406_s1 + $0x80] sm:$0xff]  ;;  %v554_v53 = vsub.s32 1, %v4759_v4  ;;  %v4356_v60 = vpack.c.bf16 %v3448_v50, %v3447_v1 }
 0x115   :  { %v546_v58 = vsel %vm470_vm13, %v4843_v51, %v508_v48  ;;  %v3446_v51 = vld [vmem:[%s6406_s1 + $0x88] sm:$0xff] }
 0x116   :  { %4341 = vmatprep.subr.bf16.mxu0 %v4340_v54  ;;  %v4352_v55 = vpack.c.bf16 %v3446_v51, %v3445_v7  ;;  %v4931_v37 = vrot.slane %v4765_v6, %v554_v53 }
 0x117   :  { %3975 = vmatmul.mubr.msk.f32.gmra.mrb[42].mxu1 %vm63_vm0, %v534_v15  ;;  %4343 = vmatpush3.bf16.msra.mxu0 %v4340_v54 }
 0x118   :  { %3977 = vmatprep.mubr.msk.f32.mxu1 %vm63_vm0, %v535_v2  ;;  %4353 = vmatprep.subr.bf16.mxu0 %v4352_v55 }
 0x11b   :  { %3978 = vmatmul.mubr.msk.f32.gmra.mrb[44].mxu1 %vm63_vm0, %v536_v10 }
 0x11c   :  { %3980 = vmatprep.mubr.msk.f32.mxu1 %vm63_vm0, %v537_v13 }
 0x11f   :  { %3981 = vmatmul.mubr.msk.f32.gmra.mrb[46].mxu1 %vm63_vm0, %v538_v41 }
 0x120   :  { %3983 = vmatprep.mubr.msk.f32.mxu1 %vm63_vm0, %v539_v35 }
 0x123   :  { %3984 = vmatmul.mubr.msk.f32.gmra.mrb[48].mxu1 %vm63_vm0, %v540_v44 }
 0x124   :  { %3986 = vmatprep.mubr.msk.f32.mxu1 %vm63_vm0, %v541_v9 }
 0x127   :  { %3987 = vmatmul.mubr.msk.f32.gmra.mrb[50].mxu1 %vm63_vm0, %v542_v49 }
 0x128   :  { %3989 = vmatprep.mubr.msk.f32.mxu1 %vm63_vm0, %v543_v47 }
 0x12b   :  { %3990 = vmatmul.mubr.msk.f32.gmra.mrb[52].mxu1 %vm63_vm0, %v544_v52 }
 0x12c   :  { %3992 = vmatprep.mubr.msk.f32.mxu1 %vm63_vm0, %v545_v11 }
 0x12f   :  { %3993 = vmatmul.mubr.msk.f32.gmra.mrb[54].mxu1 %vm63_vm0, %v546_v58 }
 0x1ba   :  { %v3940_v56 = vpop.f32.mrb[18].mxu1 }
 0x1bb   :  { %v742_v61 = vadd.f32 %v3940_v56, %v4931_v37  ;;  %v736_v62 = vpop.f32.mrb[19].mxu1 }
 0x1bc   :  { %v737_v0 = vadd.f32 %v736_v62, %v4931_v37 }
 0x1bd   :  { %v964_v63 = vmul.f32 0.01, %v742_v61  ;;  %vm926_vm14 = vcmp.gt.f32.partialorder %v742_v61, 0.0 }
 0x1be   :  { %vm925_vm15 = vcmp.gt.f32.partialorder %v737_v0, 0.0  ;;  %v963_v2 = vmul.f32 0.01, %v737_v0  ;;  %v3943_v6 = vpop.f32.mrb[20].mxu1 }
 0x1bf   :  { %v752_v3 = vadd.f32 %v3943_v6, %v4931_v37  ;;  %v746_v5 = vpop.f32.mrb[21].mxu1  ;;  %v1002_v13 = vsel %vm926_vm14, %v742_v61, %v964_v63 }
 0x1c0   :  { %v747_v16 = vadd.f32 %v746_v5, %v4931_v37  ;;  %v1001_v15 = vsel %vm925_vm15, %v737_v0, %v963_v2 }
 0x1c1   :  { %v966_v17 = vmul.f32 0.01, %v752_v3  ;;  %4003 = vmatprep.mubr.msk.f32.mxu0 %vm63_vm0, %v1001_v15  ;;  %4068 = vmatprep.mubr.msk.f32.mxu1 %vm63_vm0, %v1001_v15  ;;  %vm928_vm1 = vcmp.gt.f32.partialorder %v752_v3, 0.0 }
 0x1c2   :  { %vm927_vm2 = vcmp.gt.f32.partialorder %v747_v16, 0.0  ;;  %v965_v18 = vmul.f32 0.01, %v747_v16  ;;  %v3946_v46 = vpop.f32.mrb[22].mxu1  ;;  %4004 = vmatmul.mubr.msk.f32.vlgmr.msra.gmra.mrb[20].mxu0 %vm63_vm0, %v1002_v13  ;;  %4069 = vmatmul.mubr.msk.f32.vlgmr.msra.gmra.mrb[56].mxu1 %vm63_vm0, %v1002_v13 }
 0x1c3   :  { %v762_v10 = vadd.f32 %v3946_v46, %v4931_v37  ;;  %v756_v12 = vpop.f32.mrb[23].mxu1  ;;  %4355 = vmatpush3.bf16.msra.mxu0 %v4352_v55  ;;  %v1004_v59 = vsel %vm928_vm1, %v752_v3, %v966_v17 }
 0x1c4   :  { %v757_v35 = vadd.f32 %v756_v12, %v4931_v37  ;;  %v1003_v40 = vsel %vm927_vm2, %v747_v16, %v965_v18  ;;  %4357 = vmatprep.subr.bf16.mxu0 %v4356_v60 }
 0x1c5   :  { %v968_v41 = vmul.f32 0.01, %v762_v10  ;;  %4006 = vmatprep.mubr.msk.f32.mxu0 %vm63_vm0, %v1003_v40  ;;  %4071 = vmatprep.mubr.msk.f32.mxu1 %vm63_vm0, %v1003_v40  ;;  %vm930_vm4 = vcmp.gt.f32.partialorder %v762_v10, 0.0 }
 0x1c6   :  { %vm929_vm5 = vcmp.gt.f32.partialorder %v757_v35, 0.0  ;;  %v967_v9 = vmul.f32 0.01, %v757_v35  ;;  %v3949_v43 = vpop.f32.mrb[24].mxu1  ;;  %4007 = vmatmul.mubr.msk.f32.gmra.mrb[22].mxu0 %vm63_vm0, %v1004_v59  ;;  %4072 = vmatmul.mubr.msk.f32.gmra.mrb[58].mxu1 %vm63_vm0, %v1004_v59 }
 0x1c7   :  { %v772_v44 = vadd.f32 %v3949_v43, %v4931_v37  ;;  %v766_v45 = vpop.f32.mrb[25].mxu1  ;;  %4359 = vmatpush3.bf16.msra.mxu0 %v4356_v60  ;;  %v1006_v11 = vsel %vm930_vm4, %v762_v10, %v968_v41 }
 0x1c8   :  { %v767_v47 = vadd.f32 %v766_v45, %v4931_v37  ;;  %v1005_v42 = vsel %vm929_vm5, %v757_v35, %v967_v9 }
 0x1c9   :  { %v970_v49 = vmul.f32 0.01, %v772_v44  ;;  %4009 = vmatprep.mubr.msk.f32.mxu0 %vm63_vm0, %v1005_v42  ;;  %4074 = vmatprep.mubr.msk.f32.mxu1 %vm63_vm0, %v1005_v42  ;;  %vm932_vm6 = vcmp.gt.f32.partialorder %v772_v44, 0.0 }
 0x1ca   :  { %vm931_vm7 = vcmp.gt.f32.partialorder %v767_v47, 0.0  ;;  %v969_v48 = vmul.f32 0.01, %v767_v47  ;;  %v3952_v52 = vpop.f32.mrb[26].mxu1  ;;  %4010 = vmatmul.mubr.msk.f32.gmra.mrb[24].mxu0 %vm63_vm0, %v1006_v11  ;;  %4075 = vmatmul.mubr.msk.f32.gmra.mrb[60].mxu1 %vm63_vm0, %v1006_v11 }
 0x1cb   :  { %v782_v58 = vadd.f32 %v3952_v52, %v4931_v37  ;;  %v776_v36 = vpop.f32.mrb[27].mxu1  ;;  %v1008_v51 = vsel %vm932_vm6, %v772_v44, %v970_v49 }
 0x1cc   :  { %v777_v57 = vadd.f32 %v776_v36, %v4931_v37  ;;  %v1007_v54 = vsel %vm931_vm7, %v767_v47, %v969_v48 }
 0x1cd   :  { %v972_v7 = vmul.f32 0.01, %v782_v58  ;;  %4012 = vmatprep.mubr.msk.f32.mxu0 %vm63_vm0, %v1007_v54  ;;  %4077 = vmatprep.mubr.msk.f32.mxu1 %vm63_vm0, %v1007_v54  ;;  %vm934_vm8 = vcmp.gt.f32.partialorder %v782_v58, 0.0 }
 0x1ce   :  { %vm933_vm9 = vcmp.gt.f32.partialorder %v777_v57, 0.0  ;;  %v971_v55 = vmul.f32 0.01, %v777_v57  ;;  %v3955_v53 = vpop.f32.mrb[28].mxu1  ;;  %4013 = vmatmul.mubr.msk.f32.gmra.mrb[26].mxu0 %vm63_vm0, %v1008_v51  ;;  %4078 = vmatmul.mubr.msk.f32.gmra.mrb[62].mxu1 %vm63_vm0, %v1008_v51 }
 0x1cf   :  { %v792_v56 = vadd.f32 %v3955_v53, %v4931_v37  ;;  %v786_v61 = vpop.f32.mrb[29].mxu1  ;;  %v1010_v1 = vsel %vm934_vm8, %v782_v58, %v972_v7 }
 0x1d0   :  { %v787_v62 = vadd.f32 %v786_v61, %v4931_v37  ;;  %v1009_v0 = vsel %vm933_vm9, %v777_v57, %v971_v55 }
 0x1d1   :  { %v974_v63 = vmul.f32 0.01, %v792_v56  ;;  %4015 = vmatprep.mubr.msk.f32.mxu0 %vm63_vm0, %v1009_v0  ;;  %4080 = vmatprep.mubr.msk.f32.mxu1 %vm63_vm0, %v1009_v0  ;;  %vm936_vm10 = vcmp.gt.f32.partialorder %v792_v56, 0.0 }
 0x1d2   :  { %vm935_vm11 = vcmp.gt.f32.partialorder %v787_v62, 0.0  ;;  %v973_v50 = vmul.f32 0.01, %v787_v62  ;;  %v3958_v2 = vpop.f32.mrb[30].mxu1  ;;  %4016 = vmatmul.mubr.msk.f32.gmra.mrb[28].mxu0 %vm63_vm0, %v1010_v1  ;;  %4081 = vmatmul.mubr.msk.f32.gmra.mrb[64].mxu1 %vm63_vm0, %v1010_v1 }
 0x1d3   :  { %v802_v6 = vadd.f32 %v3958_v2, %v4931_v37  ;;  %v796_v3 = vpop.f32.mrb[31].mxu1  ;;  %v1012_v60 = vsel %vm936_vm10, %v792_v56, %v974_v63 }
 0x1d4   :  { %v797_v5 = vadd.f32 %v796_v3, %v4931_v37  ;;  %v1011_v16 = vsel %vm935_vm11, %v787_v62, %v973_v50 }
 0x1d5   :  { %v976_v15 = vmul.f32 0.01, %v802_v6  ;;  %4018 = vmatprep.mubr.msk.f32.mxu0 %vm63_vm0, %v1011_v16  ;;  %4083 = vmatprep.mubr.msk.f32.mxu1 %vm63_vm0, %v1011_v16  ;;  %vm938_vm12 = vcmp.gt.f32.partialorder %v802_v6, 0.0 }
 0x1d6   :  { %vm937_vm13 = vcmp.gt.f32.partialorder %v797_v5, 0.0  ;;  %v975_v13 = vmul.f32 0.01, %v797_v5  ;;  %v3961_v17 = vpop.f32.mrb[32].mxu1  ;;  %4019 = vmatmul.mubr.msk.f32.gmra.mrb[30].mxu0 %vm63_vm0, %v1012_v60  ;;  %4084 = vmatmul.mubr.msk.f32.gmra.mrb[66].mxu1 %vm63_vm0, %v1012_v60 }
 0x1d7   :  { %v812_v18 = vadd.f32 %v3961_v17, %v4931_v37  ;;  %v806_v46 = vpop.f32.mrb[33].mxu1  ;;  %v1014_v40 = vsel %vm938_vm12, %v802_v6, %v976_v15 }
 0x1d8   :  { %v807_v10 = vadd.f32 %v806_v46, %v4931_v37  ;;  %v1013_v12 = vsel %vm937_vm13, %v797_v5, %v975_v13 }
 0x1d9   :  { %v978_v35 = vmul.f32 0.01, %v812_v18  ;;  %4021 = vmatprep.mubr.msk.f32.mxu0 %vm63_vm0, %v1013_v12  ;;  %4086 = vmatprep.mubr.msk.f32.mxu1 %vm63_vm0, %v1013_v12  ;;  %vm940_vm14 = vcmp.gt.f32.partialorder %v812_v18, 0.0 }
 0x1da   :  { %vm939_vm15 = vcmp.gt.f32.partialorder %v807_v10, 0.0  ;;  %v977_v41 = vmul.f32 0.01, %v807_v10  ;;  %v3964_v59 = vpop.f32.mrb[34].mxu1  ;;  %4022 = vmatmul.mubr.msk.f32.gmra.mrb[32].mxu0 %vm63_vm0, %v1014_v40  ;;  %4087 = vmatmul.mubr.msk.f32.gmra.mrb[68].mxu1 %vm63_vm0, %v1014_v40 }
 0x1db   :  { %v822_v9 = vadd.f32 %v3964_v59, %v4931_v37  ;;  %v816_v43 = vpop.f32.mrb[35].mxu1  ;;  %v1016_v42 = vsel %vm940_vm14, %v812_v18, %v978_v35 }
 0x1dc   :  { %v817_v44 = vadd.f32 %v816_v43, %v4931_v37  ;;  %v1015_v45 = vsel %vm939_vm15, %v807_v10, %v977_v41 }
 0x1dd   :  { %v980_v47 = vmul.f32 0.01, %v822_v9  ;;  %4024 = vmatprep.mubr.msk.f32.mxu0 %vm63_vm0, %v1015_v45  ;;  %4089 = vmatprep.mubr.msk.f32.mxu1 %vm63_vm0, %v1015_v45  ;;  %vm942_vm1 = vcmp.gt.f32.partialorder %v822_v9, 0.0 }
 0x1de   :  { %vm941_vm2 = vcmp.gt.f32.partialorder %v817_v44, 0.0  ;;  %v979_v49 = vmul.f32 0.01, %v817_v44  ;;  %v3967_v11 = vpop.f32.mrb[36].mxu1  ;;  %4025 = vmatmul.mubr.msk.f32.gmra.mrb[34].mxu0 %vm63_vm0, %v1016_v42  ;;  %4090 = vmatmul.mubr.msk.f32.gmra.mrb[70].mxu1 %vm63_vm0, %v1016_v42 }
 0x1df   :  { %v832_v48 = vadd.f32 %v3967_v11, %v4931_v37  ;;  %v826_v52 = vpop.f32.mrb[37].mxu1  ;;  %v1018_v54 = vsel %vm942_vm1, %v822_v9, %v980_v47 }
 0x1e0   :  { %v827_v58 = vadd.f32 %v826_v52, %v4931_v37  ;;  %v1017_v36 = vsel %vm941_vm2, %v817_v44, %v979_v49 }
 0x1e1   :  { %v982_v57 = vmul.f32 0.01, %v832_v48  ;;  %4027 = vmatprep.mubr.msk.f32.mxu0 %vm63_vm0, %v1017_v36  ;;  %4092 = vmatprep.mubr.msk.f32.mxu1 %vm63_vm0, %v1017_v36  ;;  %vm944_vm4 = vcmp.gt.f32.partialorder %v832_v48, 0.0 }
 0x1e2   :  { %vm943_vm5 = vcmp.gt.f32.partialorder %v827_v58, 0.0  ;;  %v981_v7 = vmul.f32 0.01, %v827_v58  ;;  %v3970_v51 = vpop.f32.mrb[38].mxu1  ;;  %4028 = vmatmul.mubr.msk.f32.gmra.mrb[36].mxu0 %vm63_vm0, %v1018_v54  ;;  %4093 = vmatmul.mubr.msk.f32.gmra.mrb[72].mxu1 %vm63_vm0, %v1018_v54 }
 0x1e3   :  { %v842_v55 = vadd.f32 %v3970_v51, %v4931_v37  ;;  %v836_v53 = vpop.f32.mrb[39].mxu1  ;;  %v1020_v0 = vsel %vm944_vm4, %v832_v48, %v982_v57 }
 0x1e4   :  { %v837_v56 = vadd.f32 %v836_v53, %v4931_v37  ;;  %v1019_v61 = vsel %vm943_vm5, %v827_v58, %v981_v7 }
 0x1e5   :  { %v984_v62 = vmul.f32 0.01, %v842_v55  ;;  %4030 = vmatprep.mubr.msk.f32.mxu0 %vm63_vm0, %v1019_v61  ;;  %4095 = vmatprep.mubr.msk.f32.mxu1 %vm63_vm0, %v1019_v61  ;;  %vm946_vm6 = vcmp.gt.f32.partialorder %v842_v55, 0.0 }
 0x1e6   :  { %vm945_vm7 = vcmp.gt.f32.partialorder %v837_v56, 0.0  ;;  %v983_v63 = vmul.f32 0.01, %v837_v56  ;;  %v3973_v1 = vpop.f32.mrb[40].mxu1  ;;  %4031 = vmatmul.mubr.msk.f32.gmra.mrb[38].mxu0 %vm63_vm0, %v1020_v0  ;;  %4096 = vmatmul.mubr.msk.f32.gmra.mrb[74].mxu1 %vm63_vm0, %v1020_v0 }
 0x1e7   :  { %v852_v50 = vadd.f32 %v3973_v1, %v4931_v37  ;;  %v846_v2 = vpop.f32.mrb[41].mxu1  ;;  %v1022_v16 = vsel %vm946_vm6, %v842_v55, %v984_v62 }
 0x1e8   :  { %v847_v6 = vadd.f32 %v846_v2, %v4931_v37  ;;  %v1021_v3 = vsel %vm945_vm7, %v837_v56, %v983_v63 }
 0x1e9   :  { %v986_v5 = vmul.f32 0.01, %v852_v50  ;;  %4033 = vmatprep.mubr.msk.f32.mxu0 %vm63_vm0, %v1021_v3  ;;  %4098 = vmatprep.mubr.msk.f32.mxu1 %vm63_vm0, %v1021_v3  ;;  %vm948_vm8 = vcmp.gt.f32.partialorder %v852_v50, 0.0 }
 0x1ea   :  { %vm947_vm9 = vcmp.gt.f32.partialorder %v847_v6, 0.0  ;;  %v985_v15 = vmul.f32 0.01, %v847_v6  ;;  %v3976_v60 = vpop.f32.mrb[42].mxu1  ;;  %4034 = vmatmul.mubr.msk.f32.gmra.mrb[40].mxu0 %vm63_vm0, %v1022_v16  ;;  %4099 = vmatmul.mubr.msk.f32.gmra.mrb[76].mxu1 %vm63_vm0, %v1022_v16 }
 0x1eb   :  { %v862_v13 = vadd.f32 %v3976_v60, %v4931_v37  ;;  %v856_v17 = vpop.f32.mrb[43].mxu1  ;;  %v1024_v12 = vsel %vm948_vm8, %v852_v50, %v986_v5 }
 0x1ec   :  { %v857_v18 = vadd.f32 %v856_v17, %v4931_v37  ;;  %v1023_v46 = vsel %vm947_vm9, %v847_v6, %v985_v15 }
 0x1ed   :  { %v988_v10 = vmul.f32 0.01, %v862_v13  ;;  %4036 = vmatprep.mubr.msk.f32.mxu0 %vm63_vm0, %v1023_v46  ;;  %4101 = vmatprep.mubr.msk.f32.mxu1 %vm63_vm0, %v1023_v46  ;;  %vm950_vm10 = vcmp.gt.f32.partialorder %v862_v13, 0.0 }
 0x1ee   :  { %vm949_vm11 = vcmp.gt.f32.partialorder %v857_v18, 0.0  ;;  %v987_v35 = vmul.f32 0.01, %v857_v18  ;;  %v3979_v40 = vpop.f32.mrb[44].mxu1  ;;  %4037 = vmatmul.mubr.msk.f32.gmra.mrb[42].mxu0 %vm63_vm0, %v1024_v12  ;;  %4102 = vmatmul.mubr.msk.f32.gmra.mrb[78].mxu1 %vm63_vm0, %v1024_v12 }
 0x1ef   :  { %v872_v41 = vadd.f32 %v3979_v40, %v4931_v37  ;;  %v866_v59 = vpop.f32.mrb[45].mxu1  ;;  %v1026_v45 = vsel %vm950_vm10, %v862_v13, %v988_v10  ;;  %vm3122_vm10 = vcmp.ge.s32.totalorder %v4524_v8, 12 }
 0x1f0   :  { %v867_v9 = vadd.f32 %v866_v59, %v4931_v37  ;;  %v1025_v43 = vsel %vm949_vm11, %v857_v18, %v987_v35  ;;  %vm3123_vm11 = vcmp.lt.s32.totalorder %v4524_v8, 16  ;;  %v5345_v8 = vld [vmem:[%s6407_s0 + $0xd0] sm:$0xff] }
 0x1f1   :  { %v990_v44 = vmul.f32 0.01, %v872_v41  ;;  %4039 = vmatprep.mubr.msk.f32.mxu0 %vm63_vm0, %v1025_v43  ;;  %4104 = vmatprep.mubr.msk.f32.mxu1 %vm63_vm0, %v1025_v43  ;;  %vm952_vm12 = vcmp.gt.f32.partialorder %v872_v41, 0.0  ;;  %6437 = vst [vmem:[#allocation12_spill] sm:$0xff] %v5345_v8 }
 0x1f2   :  { %vm951_vm13 = vcmp.gt.f32.partialorder %v867_v9, 0.0  ;;  %v989_v47 = vmul.f32 0.01, %v867_v9  ;;  %v3982_v42 = vpop.f32.mrb[46].mxu1  ;;  %4040 = vmatmul.mubr.msk.f32.gmra.mrb[44].mxu0 %vm63_vm0, %v1026_v45  ;;  %4105 = vmatmul.mubr.msk.f32.gmra.mrb[80].mxu1 %vm63_vm0, %v1026_v45 }
 0x1f3   :  { %v882_v49 = vadd.f32 %v3982_v42, %v4931_v37  ;;  %v876_v11 = vpop.f32.mrb[47].mxu1  ;;  %v1028_v36 = vsel %vm952_vm12, %v872_v41, %v990_v44  ;;  %v3488_v42 = vld [vmem:[%s6406_s1 + $0xa8] sm:$0xff]  ;;  %vm5327_vm12 = vmand %vm3122_vm10, %vm3123_vm11 }
 0x1f4   :  { %v877_v48 = vadd.f32 %v876_v11, %v4931_v37  ;;  %v1027_v52 = vsel %vm951_vm13, %v867_v9, %v989_v47  ;;  %v3487_v47 = vld [vmem:[%s6406_s1 + $0xa0] sm:$0xff] }
 0x1f5   :  { %v992_v58 = vmul.f32 0.01, %v882_v49  ;;  %4042 = vmatprep.mubr.msk.f32.mxu0 %vm63_vm0, %v1027_v52  ;;  %4107 = vmatprep.mubr.msk.f32.mxu1 %vm63_vm0, %v1027_v52  ;;  %vm954_vm14 = vcmp.gt.f32.partialorder %v882_v49, 0.0  ;;  %v4360_v11 = vpack.c.bf16 %v3488_v42, %v3487_v47 }
 0x1f6   :  { %vm953_vm15 = vcmp.gt.f32.partialorder %v877_v48, 0.0  ;;  %v991_v57 = vmul.f32 0.01, %v877_v48  ;;  %v3985_v54 = vpop.f32.mrb[48].mxu1  ;;  %4043 = vmatmul.mubr.msk.f32.gmra.mrb[46].mxu0 %vm63_vm0, %v1028_v36  ;;  %4108 = vmatmul.mubr.msk.f32.gmra.mrb[82].mxu1 %vm63_vm0, %v1028_v36  ;;  %v5069_v36 = vld [vmem:[%s6408_s2] sm:$0xff] }
 0x1f7   :  { %v892_v7 = vadd.f32 %v3985_v54, %v4931_v37  ;;  %v886_v51 = vpop.f32.mrb[49].mxu1  ;;  %v1030_v61 = vsel %vm954_vm14, %v882_v49, %v992_v58  ;;  %v3489_v49 = vld [vmem:[%s6406_s1 + $0xb0] sm:$0xff]  ;;  %4361 = vmatprep.subr.bf16.mxu1 %v4360_v11  ;;  %v1424_v58 = vsub.s32 3, %v4759_v4 }
 0x1f8   :  { %v887_v55 = vadd.f32 %v886_v51, %v4931_v37  ;;  %v1029_v53 = vsel %vm953_vm15, %v877_v48, %v991_v57  ;;  %v3490_v48 = vld [vmem:[%s6406_s1 + $0xb8] sm:$0xff]  ;;  %4363 = vmatpush3.bf16.msra.mxu1 %v4360_v11  ;;  %v5275_v11 = vld [vmem:[%s6407_s0 + $0xa0] sm:$0xff] }
 0x1f9   :  { %v994_v56 = vmul.f32 0.01, %v892_v7  ;;  %4045 = vmatprep.mubr.msk.f32.mxu0 %vm63_vm0, %v1029_v53  ;;  %4110 = vmatprep.mubr.msk.f32.mxu1 %vm63_vm0, %v1029_v53  ;;  %vm956_vm1 = vcmp.gt.f32.partialorder %v892_v7, 0.0  ;;  %v4364_v52 = vpack.c.bf16 %v3490_v48, %v3489_v49  ;;  %v5072_v57 = vrot.slane %v5069_v36, %v1424_v58  ;;  %v5184_v49 = vld [vmem:[%s6407_s0 + $0x58] sm:$0xff]  ;;  %v5192_v48 = vld [vmem:[%s6407_s0 + $0x60] sm:$0xff] }
 0x1fa   :  { %vm955_vm2 = vcmp.gt.f32.partialorder %v887_v55, 0.0  ;;  %v993_v62 = vmul.f32 0.01, %v887_v55  ;;  %v3988_v0 = vpop.f32.mrb[50].mxu1  ;;  %4046 = vmatmul.mubr.msk.f32.gmra.mrb[48].mxu0 %vm63_vm0, %v1030_v61  ;;  %4111 = vmatmul.mubr.msk.f32.gmra.mrb[84].mxu1 %vm63_vm0, %v1030_v61  ;;  %v5354_v61 = vld [vmem:[%s6407_s0 + $0xd8] sm:$0xff] }
 0x1fb   :  { %v902_v63 = vadd.f32 %v3988_v0, %v4931_v37  ;;  %v896_v1 = vpop.f32.mrb[51].mxu1  ;;  %v1032_v3 = vsel %vm956_vm1, %v892_v7, %v994_v56  ;;  %4365 = vmatprep.subr.bf16.mxu1 %v4364_v52  ;;  %v5084_v56 = vld [vmem:[%s6407_s0] sm:$0xff]  ;;  %6438 = vst [vmem:[#allocation13_spill] sm:$0xff] %v5354_v61 }
 0x1fc   :  { %v897_v50 = vadd.f32 %v896_v1, %v4931_v37  ;;  %v1031_v2 = vsel %vm955_vm2, %v887_v55, %v993_v62  ;;  %4367 = vmatpush3.bf16.msra.mxu1 %v4364_v52  ;;  %v5092_v62 = vld [vmem:[%s6407_s0 + $0x8] sm:$0xff] }
 0x1fd   :  { %v996_v6 = vmul.f32 0.01, %v902_v63  ;;  %4048 = vmatprep.mubr.msk.f32.mxu0 %vm63_vm0, %v1031_v2  ;;  %4113 = vmatprep.mubr.msk.f32.mxu1 %vm63_vm0, %v1031_v2  ;;  %vm958_vm4 = vcmp.gt.f32.partialorder %v902_v63, 0.0  ;;  %v5111_v2 = vld [vmem:[%s6407_s0 + $0x18] sm:$0xff]  ;;  %v6439_v27 = vsel %vm4544_vm3, %v5092_v62, 0.0 }
 0x1fe   :  { %vm957_vm5 = vcmp.gt.f32.partialorder %v897_v50, 0.0  ;;  %v995_v5 = vmul.f32 0.01, %v897_v50  ;;  %v3991_v16 = vpop.f32.mrb[52].mxu1  ;;  %4049 = vmatmul.mubr.msk.f32.gmra.mrb[50].mxu0 %vm63_vm0, %v1032_v3  ;;  %4114 = vmatmul.mubr.msk.f32.gmra.mrb[86].mxu1 %vm63_vm0, %v1032_v3  ;;  %v5119_v3 = vld [vmem:[%s6407_s0 + $0x20] sm:$0xff] }
 0x1ff   :  { %v912_v15 = vadd.f32 %v3991_v16, %v4931_v37  ;;  %v906_v60 = vpop.f32.mrb[53].mxu1  ;;  %v1034_v46 = vsel %vm958_vm4, %v902_v63, %v996_v6  ;;  %v5100_v63 = vld [vmem:[%s6407_s0 + $0x10] sm:$0xff]  ;;  %v5127_v16 = vld [vmem:[%s6407_s0 + $0x28] sm:$0xff] }
 0x200   :  { %v907_v13 = vadd.f32 %v906_v60, %v4931_v37  ;;  %v1033_v17 = vsel %vm957_vm5, %v897_v50, %v995_v5  ;;  %v5337_v6 = vld [vmem:[%s6407_s0 + $0xc8] sm:$0xff] }
 0x201   :  { %v998_v18 = vmul.f32 0.01, %v912_v15  ;;  %4051 = vmatprep.mubr.msk.f32.mxu0 %vm63_vm0, %v1033_v17  ;;  %4116 = vmatprep.mubr.msk.f32.mxu1 %vm63_vm0, %v1033_v17  ;;  %vm960_vm6 = vcmp.gt.f32.partialorder %v912_v15, 0.0  ;;  %v5310_v17 = vld [vmem:[%s6407_s0 + $0xb8] sm:$0xff] }
 0x202   :  { %vm959_vm7 = vcmp.gt.f32.partialorder %v907_v13, 0.0  ;;  %v997_v10 = vmul.f32 0.01, %v907_v13  ;;  %v3994_v12 = vpop.f32.mrb[54].mxu1  ;;  %4052 = vmatmul.mubr.msk.f32.gmra.mrb[52].mxu0 %vm63_vm0, %v1034_v46  ;;  %4117 = vmatmul.mubr.msk.f32.gmra.mrb[88].mxu1 %vm63_vm0, %v1034_v46 }
 0x203   :  { %v922_v35 = vadd.f32 %v3994_v12, %v4931_v37  ;;  %v916_v40 = vpop.f32.mrb[55].mxu1  ;;  %v1036_v43 = vsel %vm960_vm6, %v912_v15, %v998_v18  ;;  %v5144_v18 = vld [vmem:[%s6407_s0 + $0x38] sm:$0xff] }
 0x204   :  { %v917_v41 = vadd.f32 %v916_v40, %v4931_v37  ;;  %v1035_v59 = vsel %vm959_vm7, %v907_v13, %v997_v10  ;;  %v5136_v13 = vld [vmem:[%s6407_s0 + $0x30] sm:$0xff]  ;;  %v5152_v10 = vld [vmem:[%s6407_s0 + $0x40] sm:$0xff] }
 0x205   :  { %v1000_v9 = vmul.f32 0.01, %v922_v35  ;;  %4054 = vmatprep.mubr.msk.f32.mxu0 %vm63_vm0, %v1035_v59  ;;  %4119 = vmatprep.mubr.msk.f32.mxu1 %vm63_vm0, %v1035_v59  ;;  %vm962_vm8 = vcmp.gt.f32.partialorder %v922_v35, 0.0  ;;  %v5163_v59 = vld [vmem:[%s6407_s0 + $0x48] sm:$0xff] }
 0x206   :  { %vm961_vm9 = vcmp.gt.f32.partialorder %v917_v41, 0.0  ;;  %v999_v44 = vmul.f32 0.01, %v917_v41  ;;  %4055 = vmatmul.mubr.msk.f32.gmra.mrb[54].mxu0 %vm63_vm0, %v1036_v43  ;;  %4120 = vmatmul.mubr.msk.f32.gmra.mrb[90].mxu1 %vm63_vm0, %v1036_v43  ;;  %v5171_v43 = vld [vmem:[%s6407_s0 + $0x50] sm:$0xff] }
 0x207   :  { %v1038_v37 = vsel %vm962_vm8, %v922_v35, %v1000_v9  ;;  %v5289_v9 = vld [vmem:[%s6407_s0 + $0xa8] sm:$0xff] }
 0x208   :  { %v1037_v45 = vsel %vm961_vm9, %v917_v41, %v999_v44 }
 0x209   :  { %4057 = vmatprep.mubr.msk.f32.mxu0 %vm63_vm0, %v1037_v45  ;;  %4122 = vmatprep.mubr.msk.f32.mxu1 %vm63_vm0, %v1037_v45 }
 0x20a   :  { %4058 = vmatmul.mubr.msk.f32.gmra.mrb[56].mxu0 %vm63_vm0, %v1038_v37  ;;  %4123 = vmatmul.mubr.msk.f32.gmra.mrb[92].mxu1 %vm63_vm0, %v1038_v37 }
 0x295   :  { %v5074_v54 = vpop.f32.mrb[20].mxu0  ;;  %v4070_v7 = vpop.f32.mrb[56].mxu1 }
 0x296   :  { %v5077_v51 = vadd.f32 %v4070_v7, %v5072_v57  ;;  %v5079_v55 = vpop.f32.mrb[21].mxu0  ;;  %v1492_v53 = vpop.f32.mrb[57].mxu1 }
 0x297   :  { %v5106_v50 = vadd.f32 %v1492_v53, %v5072_v57  ;;  %v5203_v53 = vld [vmem:[%s6407_s0 + $0x68] sm:$0xff] }
 0x298   :  { %v1723_v60 = vmul.f32 0.5, %v5077_v51  ;;  %v3126_v34 = vsel %vm5327_vm12, %v5077_v51, 0.0 }
 0x299   :  { %v1722_v35 = vmul.f32 0.5, %v5106_v50  ;;  %v5158_v40 = vpop.f32.mrb[22].mxu0  ;;  %v4073_v41 = vpop.f32.mrb[58].mxu1  ;;  %v3125_v51 = vsel %vm5327_vm12, %v5106_v50, 0.0 }
 0x29a   :  { %v1762_v45 = vmul.f32 1.442695, %v1723_v60  ;;  %v5177_v37 = vadd.f32 %v4073_v41, %v5072_v57  ;;  %v5179_v47 = vpop.f32.mrb[23].mxu0  ;;  %v1502_v42 = vpop.f32.mrb[59].mxu1  ;;  %v5211_v41 = vld [vmem:[%s6407_s0 + $0x70] sm:$0xff] }
 0x29b   :  { %v1760_v58 = vmul.f32 1.442695, %v1722_v35  ;;  %v5198_v7 = vadd.f32 %v1502_v42, %v5072_v57 }
 0x29c   :  { %4380 = vpow2.f32 %v1762_v45  ;;  %v1725_v42 = vmul.f32 0.5, %v5177_v37  ;;  %v5232_v45 = vld [vmem:[%s6407_s0 + $0x80] sm:$0xff] }
 0x29d   :  { %4382 = vpow2.f32 %v1760_v58  ;;  %v1724_v32 = vmul.f32 0.5, %v5198_v7  ;;  %v5227_v26 = vpop.f32.mrb[24].mxu0  ;;  %v4076_v30 = vpop.f32.mrb[60].mxu1  ;;  %v5261_v58 = vld [vmem:[%s6407_s0 + $0x98] sm:$0xff] }
 0x29e   :  { %v1766_v20 = vmul.f32 1.442695, %v1725_v42  ;;  %v5246_v35 = vadd.f32 %v4076_v30, %v5072_v57  ;;  %v5248_v39 = vpop.f32.mrb[25].mxu0  ;;  %v1512_v52 = vpop.f32.mrb[61].mxu1 }
 0x29f   :  { %v1764_v42 = vmul.f32 1.442695, %v1724_v32  ;;  %v5267_v44 = vadd.f32 %v1512_v52, %v5072_v57  ;;  %v5281_v32 = vrot.slane %v5069_v36, %v1046_v31  ;;  %v5297_v31 = vld [vmem:[%s6407_s0 + $0xb0] sm:$0xff]  ;;  %v5318_v36 = vld [vmem:[%s6407_s0 + $0xc0] sm:$0xff] }
 0x2a0   :  { %4384 = vpow2.f32 %v1766_v20  ;;  %v1727_v60 = vmul.f32 0.5, %v5246_v35 }
 0x2a1   :  { %4386 = vpow2.f32 %v1764_v42  ;;  %v1726_v52 = vmul.f32 0.5, %v5267_v44  ;;  %v5284_v12 = vpop.f32.mrb[26].mxu0  ;;  %v4079_v20 = vpop.f32.mrb[62].mxu1  ;;  %v1234_v0 = vadd.f32 %v5074_v54, %v5281_v32  ;;  %v1229_v28 = vadd.f32 %v5079_v55, %v5281_v32 }
 0x2a2   :  { %v1770_v42 = vmul.f32 1.442695, %v1727_v60  ;;  %v5303_v30 = vadd.f32 %v4079_v20, %v5072_v57  ;;  %v5305_v46 = vpop.f32.mrb[27].mxu0  ;;  %v1522_v5 = vpop.f32.mrb[63].mxu1  ;;  %v1244_v19 = vadd.f32 %v5158_v40, %v5281_v32 }
 0x2a3   :  { %v1768_v1 = vmul.f32 1.442695, %v1726_v52  ;;  %v5332_v15 = vadd.f32 %v1522_v5, %v5072_v57 }
 0x2a4   :  { %4388 = vpow2.f32 %v1770_v42  ;;  %v1729_v5 = vmul.f32 0.5, %v5303_v30 }
 0x2a5   :  { %4390 = vpow2.f32 %v1768_v1  ;;  %v1728_v4 = vmul.f32 0.5, %v5332_v15  ;;  %v5362_v33 = vpop.f32.mrb[28].mxu0  ;;  %v4082_v42 = vpop.f32.mrb[64].mxu1 }
 0x2a6   :  { %v4381_v52 = vpop.eup %4380  ;;  %v1774_v29 = vmul.f32 1.442695, %v1729_v5  ;;  %v5370_v60 = vadd.f32 %v4082_v42, %v5072_v57  ;;  %v5372_v23 = vpop.f32.mrb[29].mxu0  ;;  %v6440_v5 = vsel %vm4544_vm3, %v5084_v56, 0.0  ;;  %v3128_v56 = vsel %vm5327_vm12, %v5177_v37, 0.0 }
 0x2a7   :  { %v1532_v54 = vpop.f32.mrb[65].mxu1  ;;  %v4383_v1 = vpop.eup %4382  ;;  %v1837_v21 = vmul.f32 %v4381_v52, %v6439_v27  ;;  %v1772_v22 = vmul.f32 1.442695, %v1728_v4  ;;  %v1239_v52 = vadd.f32 %v5179_v47, %v5281_v32 }
 0x2a8   :  { %v5382_v55 = vadd.f32 %v1532_v54, %v5072_v57  ;;  %v1836_v42 = vmul.f32 %v4383_v1, %v6440_v5  ;;  %4392 = vpow2.f32 %v1774_v29  ;;  %v1731_v62 = vmul.f32 0.5, %v5370_v60 }
 0x2a9   :  { %v1875_v27 = vadd.f32 %v1837_v21, %v1234_v0  ;;  %4394 = vpow2.f32 %v1772_v22  ;;  %v5394_v50 = vpop.f32.mrb[30].mxu0  ;;  %v4085_v54 = vpop.f32.mrb[66].mxu1  ;;  %v6442_v1 = vsel %vm4544_vm3, %v5111_v2, 0.0  ;;  %v1254_v2 = vadd.f32 %v5227_v26, %v5281_v32 }
 0x2aa   :  { %v1730_v4 = vmul.f32 0.5, %v5382_v55  ;;  %v4385_v8 = vpop.eup %4384  ;;  %v1874_v61 = vadd.f32 %v1836_v42, %v1229_v28  ;;  %v1778_v40 = vmul.f32 1.442695, %v1731_v62  ;;  %v5400_v29 = vadd.f32 %v4085_v54, %v5072_v57  ;;  %v5402_v21 = vpop.f32.mrb[31].mxu0 }
 0x2ab   :  { %v1542_v0 = vpop.f32.mrb[67].mxu1  ;;  %v4387_v47 = vpop.eup %4386  ;;  %v5404_v22 = vadd.f32 %v3126_v34, %v1875_v27  ;;  %v1839_v5 = vmul.f32 %v4385_v8, %v6442_v1  ;;  %v3127_v28 = vsel %vm5327_vm12, %v5198_v7, 0.0  ;;  %v6443_v62 = vsel %vm4544_vm3, %v5100_v63, 0.0 }
 0x2ac   :  { %v1776_v37 = vmul.f32 1.442695, %v1730_v4  ;;  %v5413_v42 = vadd.f32 %v3125_v51, %v1874_v61  ;;  %v1838_v54 = vmul.f32 %v4387_v47, %v6443_v62  ;;  %4396 = vpow2.f32 %v1778_v40  ;;  %4133 = vmatprep.mubr.msk.f32.mxu0 %vm63_vm0, %v1874_v61 }
 0x2ad   :  { %6441 = vst [vmem:[#allocation14_spill] sm:$0xff] %v5404_v22  ;;  %v1733_v34 = vmul.f32 0.5, %v5400_v29  ;;  %v1877_v22 = vadd.f32 %v1839_v5, %v1244_v19  ;;  %v5424_v7 = vadd.f32 %v1542_v0, %v5072_v57  ;;  %v5426_v8 = vpop.f32.mrb[32].mxu0  ;;  %v4088_v51 = vpop.f32.mrb[68].mxu1  ;;  %4134 = vmatmul.mubr.msk.f32.vlgmr.msra.gmra.mrb[58].mxu0 %vm63_vm0, %v1875_v27  ;;  %v1249_v40 = vadd.f32 %v5248_v39, %v5281_v32 }
 0x2ae   :  { %4398 = vpow2.f32 %v1776_v37  ;;  %v4389_v63 = vpop.eup %4388  ;;  %v1876_v4 = vadd.f32 %v1838_v54, %v1239_v52  ;;  %v5432_v19 = vadd.f32 %v4088_v51, %v5072_v57  ;;  %v5434_v61 = vpop.f32.mrb[33].mxu0  ;;  %v6444_v5 = vsel %vm4544_vm3, %v5127_v16, 0.0 }
 0x2af   :  { %v1782_v47 = vmul.f32 1.442695, %v1733_v34  ;;  %v1552_v26 = vpop.f32.mrb[69].mxu1  ;;  %v4391_v1 = vpop.eup %4390  ;;  %v5436_v0 = vadd.f32 %v3128_v56, %v1877_v22  ;;  %v1841_v27 = vmul.f32 %v4389_v63, %v6444_v5  ;;  %v3130_v52 = vsel %vm5327_vm12, %v5246_v35, 0.0 }
 0x2b0   :  { %v1732_v39 = vmul.f32 0.5, %v5424_v7  ;;  %v5446_v37 = vadd.f32 %v3127_v28, %v1876_v4  ;;  %v6445_v62 = vsel %vm4544_vm3, %v5119_v3, 0.0  ;;  %v1735_v56 = vmul.f32 0.5, %v5432_v19  ;;  %4136 = vmatprep.mubr.msk.f32.mxu0 %vm63_vm0, %v1876_v4 }
 0x2b1   :  { %v1840_v54 = vmul.f32 %v4391_v1, %v6445_v62  ;;  %4400 = vpow2.f32 %v1782_v47  ;;  %v1879_v16 = vadd.f32 %v1841_v27, %v1254_v2  ;;  %v3129_v34 = vsel %vm5327_vm12, %v5267_v44, 0.0  ;;  %v5459_v51 = vpop.f32.mrb[34].mxu0  ;;  %v4091_v63 = vpop.f32.mrb[70].mxu1  ;;  %4137 = vmatmul.mubr.msk.f32.gmra.mrb[60].mxu0 %vm63_vm0, %v1877_v22 }
 0x2b2   :  { %v1264_v35 = vadd.f32 %v5284_v12, %v5281_v32  ;;  %v1780_v28 = vmul.f32 1.442695, %v1732_v39  ;;  %v4393_v3 = vpop.eup %4392  ;;  %v1259_v1 = vadd.f32 %v5305_v46, %v5281_v32  ;;  %v1786_v4 = vmul.f32 1.442695, %v1735_v56  ;;  %v5467_v5 = vpop.f32.mrb[35].mxu0 }
 0x2b3   :  { %v1878_v47 = vadd.f32 %v1840_v54, %v1249_v40  ;;  %v5465_v2 = vadd.f32 %v1552_v26, %v5072_v57  ;;  %v1562_v44 = vpop.f32.mrb[71].mxu1  ;;  %v4395_v27 = vpop.eup %4394  ;;  %v5469_v12 = vadd.f32 %v3130_v52, %v1879_v16  ;;  %v6446_v39 = vsel %vm4544_vm3, %v5144_v18, 0.0 }
 0x2b4   :  { %v1843_v22 = vmul.f32 %v4393_v3, %v6446_v39  ;;  %4402 = vpow2.f32 %v1780_v28  ;;  %v5476_v40 = vadd.f32 %v4091_v63, %v5072_v57  ;;  %v6447_v26 = vsel %vm4544_vm3, %v5136_v13, 0.0 }
 0x2b5   :  { %v5478_v46 = vadd.f32 %v3129_v34, %v1878_v47  ;;  %v1842_v62 = vmul.f32 %v4395_v27, %v6447_v26  ;;  %4404 = vpow2.f32 %v1786_v4  ;;  %v1734_v52 = vmul.f32 0.5, %v5465_v2  ;;  %4139 = vmatprep.mubr.msk.f32.mxu0 %vm63_vm0, %v1878_v47  ;;  %v5493_v28 = vpop.f32.mrb[36].mxu0  ;;  %v4094_v13 = vpop.f32.mrb[72].mxu1 }
 0x2b6   :  { %v1881_v54 = vadd.f32 %v1843_v22, %v1264_v35  ;;  %v3132_v18 = vsel %vm5327_vm12, %v5303_v30, 0.0  ;;  %v3131_v56 = vsel %vm5327_vm12, %v5332_v15, 0.0  ;;  %v1737_v34 = vmul.f32 0.5, %v5476_v40  ;;  %4140 = vmatmul.mubr.msk.f32.gmra.mrb[62].mxu0 %vm63_vm0, %v1879_v16  ;;  %v4397_v63 = vpop.eup %4396  ;;  %v5501_v30 = vpop.f32.mrb[37].mxu0 }
 0x2b7   :  { %v1880_v3 = vadd.f32 %v1842_v62, %v1259_v1  ;;  %v1274_v35 = vadd.f32 %v5362_v33, %v5281_v32  ;;  %v1784_v47 = vmul.f32 1.442695, %v1734_v52  ;;  %v5499_v4 = vadd.f32 %v1562_v44, %v5072_v57  ;;  %v1572_v27 = vpop.f32.mrb[73].mxu1 }
 0x2b8   :  { %v4399_v15 = vpop.eup %4398  ;;  %v5503_v39 = vadd.f32 %v3132_v18, %v1881_v54  ;;  %v6448_v22 = vsel %vm4544_vm3, %v5163_v59, 0.0  ;;  %v1269_v1 = vadd.f32 %v5372_v23, %v5281_v32  ;;  %v1790_v26 = vmul.f32 1.442695, %v1737_v34 }
 0x2b9   :  { %v1845_v16 = vmul.f32 %v4397_v63, %v6448_v22  ;;  %v5511_v33 = vadd.f32 %v3131_v56, %v1880_v3  ;;  %v6449_v44 = vsel %vm4544_vm3, %v5152_v10, 0.0  ;;  %4406 = vpow2.f32 %v1784_v47  ;;  %4142 = vmatprep.mubr.msk.f32.mxu0 %vm63_vm0, %v1880_v3  ;;  %v5525_v56 = vpop.f32.mrb[38].mxu0  ;;  %v4097_v34 = vpop.f32.mrb[74].mxu1 }
 0x2ba   :  { %v1844_v62 = vmul.f32 %v4399_v15, %v6449_v44  ;;  %v1736_v52 = vmul.f32 0.5, %v5499_v4  ;;  %v3134_v59 = vsel %vm5327_vm12, %v5370_v60, 0.0  ;;  %4408 = vpow2.f32 %v1790_v26  ;;  %4143 = vmatmul.mubr.msk.f32.gmra.mrb[64].mxu0 %vm63_vm0, %v1881_v54  ;;  %v5534_v60 = vpop.f32.mrb[39].mxu0  ;;  %v1582_v15 = vpop.f32.mrb[75].mxu1 }
 0x2bb   :  { %v1883_v18 = vadd.f32 %v1845_v16, %v1274_v35  ;;  %v5523_v23 = vadd.f32 %v4094_v13, %v5072_v57  ;;  %v4401_v10 = vpop.eup %4400  ;;  %v3133_v3 = vsel %vm5327_vm12, %v5382_v55, 0.0  ;;  %v5532_v47 = vadd.f32 %v1572_v27, %v5072_v57 }
 0x2bc   :  { %v1882_v63 = vadd.f32 %v1844_v62, %v1269_v1  ;;  %v1788_v35 = vmul.f32 1.442695, %v1736_v52  ;;  %v1284_v22 = vadd.f32 %v5394_v50, %v5281_v32  ;;  %v6450_v54 = vsel %vm4544_vm3, %v5184_v49, 0.0 }
 0x2bd   :  { %v5536_v13 = vadd.f32 %v3134_v59, %v1883_v18  ;;  %v1847_v16 = vmul.f32 %v4401_v10, %v6450_v54  ;;  %v1739_v1 = vmul.f32 0.5, %v5523_v23  ;;  %v1279_v27 = vadd.f32 %v5402_v21, %v5281_v32  ;;  %v5557_v59 = vpop.f32.mrb[40].mxu0  ;;  %v4100_v10 = vpop.f32.mrb[76].mxu1 }
 0x2be   :  { %v5545_v55 = vadd.f32 %v3133_v3, %v1882_v63  ;;  %4410 = vpow2.f32 %v1788_v35  ;;  %v1738_v26 = vmul.f32 0.5, %v5532_v47  ;;  %4145 = vmatprep.mubr.msk.f32.mxu0 %vm63_vm0, %v1882_v63  ;;  %v4403_v44 = vpop.eup %4402  ;;  %v3136_v50 = vsel %vm5327_vm12, %v5400_v29, 0.0  ;;  %v1592_v54 = vpop.f32.mrb[77].mxu1 }
 0x2bf   :  { %v1885_v62 = vadd.f32 %v1847_v16, %v1284_v22  ;;  %v1794_v49 = vmul.f32 1.442695, %v1739_v1  ;;  %v5555_v52 = vadd.f32 %v4097_v34, %v5072_v57  ;;  %4146 = vmatmul.mubr.msk.f32.gmra.mrb[66].mxu0 %vm63_vm0, %v1883_v18  ;;  %v4405_v21 = vpop.eup %4404  ;;  %v6451_v63 = vsel %vm4544_vm3, %v5171_v43, 0.0  ;;  %v5569_v34 = vpop.f32.mrb[41].mxu0 }
 0x2c0   :  { %v1846_v3 = vmul.f32 %v4403_v44, %v6451_v63  ;;  %v1294_v35 = vadd.f32 %v5426_v8, %v5281_v32  ;;  %v1792_v22 = vmul.f32 1.442695, %v1738_v26  ;;  %v5567_v29 = vadd.f32 %v1582_v15, %v5072_v57 }
 0x2c1   :  { %v5571_v16 = vadd.f32 %v3136_v50, %v1885_v62  ;;  %v6452_v18 = vsel %vm4544_vm3, %v5203_v53, 0.0  ;;  %4412 = vpow2.f32 %v1794_v49  ;;  %v1741_v43 = vmul.f32 0.5, %v5555_v52  ;;  %v5587_v49 = vpop.f32.mrb[42].mxu0  ;;  %v4103_v63 = vpop.f32.mrb[78].mxu1 }
 0x2c2   :  { %v1849_v1 = vmul.f32 %v4405_v21, %v6452_v18  ;;  %v1884_v44 = vadd.f32 %v1846_v3, %v1279_v27  ;;  %v3135_v8 = vsel %vm5327_vm12, %v5424_v7, 0.0  ;;  %4414 = vpow2.f32 %v1792_v22  ;;  %v1602_v18 = vpop.f32.mrb[79].mxu1 }
 0x2c3   :  { %v1740_v15 = vmul.f32 0.5, %v5567_v29  ;;  %v3138_v50 = vsel %vm5327_vm12, %v5432_v19, 0.0  ;;  %v1289_v53 = vadd.f32 %v5434_v61, %v5281_v32  ;;  %v1798_v21 = vmul.f32 1.442695, %v1741_v43  ;;  %v4407_v27 = vpop.eup %4406  ;;  %v5597_v19 = vpop.f32.mrb[43].mxu0 }
 0x2c4   :  { %v1887_v26 = vadd.f32 %v1849_v1, %v1294_v35  ;;  %v5589_v3 = vadd.f32 %v3135_v8, %v1884_v44  ;;  %v1304_v7 = vadd.f32 %v5459_v51, %v5281_v32  ;;  %v5594_v35 = vadd.f32 %v4100_v10, %v5072_v57  ;;  %4148 = vmatprep.mubr.msk.f32.mxu0 %vm63_vm0, %v1884_v44  ;;  %v4409_v61 = vpop.eup %4408 }
 0x2c5   :  { %v1796_v22 = vmul.f32 1.442695, %v1740_v15  ;;  %v6455_v43 = vsel %vm4544_vm3, %v5192_v48, 0.0  ;;  %4416 = vpow2.f32 %v1798_v21  ;;  %v5606_v51 = vadd.f32 %v1592_v54, %v5072_v57  ;;  %4149 = vmatmul.mubr.msk.f32.gmra.mrb[68].mxu0 %vm63_vm0, %v1885_v62 }
 0x2c6   :  { %6453 = vst [vmem:[#allocation15_spill] sm:$0xff] %v5589_v3  ;;  %v5599_v1 = vadd.f32 %v3138_v50, %v1887_v26  ;;  %v1848_v8 = vmul.f32 %v4407_v27, %v6455_v43  ;;  %v3137_v10 = vsel %vm5327_vm12, %v5465_v2, 0.0  ;;  %v6456_v44 = vsel %vm4544_vm3, %v5220_v38, 0.0  ;;  %v5623_v27 = vpop.f32.mrb[44].mxu0  ;;  %v4106_v2 = vpop.f32.mrb[80].mxu1 }
 0x2c7   :  { %v1851_v15 = vmul.f32 %v4409_v61, %v6456_v44  ;;  %4418 = vpow2.f32 %v1796_v22  ;;  %v1743_v50 = vmul.f32 0.5, %v5594_v35  ;;  %v3140_v54 = vsel %vm5327_vm12, %v5476_v40, 0.0  ;;  %v5630_v61 = vpop.f32.mrb[45].mxu0  ;;  %v1612_v40 = vpop.f32.mrb[81].mxu1 }
 0x2c8   :  { %6454 = vst [vmem:[#allocation16_spill] sm:$0xff] %v5599_v1  ;;  %v1886_v48 = vadd.f32 %v1848_v8, %v1289_v53  ;;  %v1299_v62 = vadd.f32 %v5467_v5, %v5281_v32  ;;  %v1742_v21 = vmul.f32 0.5, %v5606_v51  ;;  %v4411_v43 = vpop.eup %4410  ;;  %v1314_v38 = vadd.f32 %v5493_v28, %v5281_v32 }
 0x2c9   :  { %v1889_v1 = vadd.f32 %v1851_v15, %v1304_v7  ;;  %v1802_v22 = vmul.f32 1.442695, %v1743_v50  ;;  %v5628_v53 = vadd.f32 %v4103_v63, %v5072_v57  ;;  %v6457_v5 = vsel %vm4544_vm3, %v5211_v41, 0.0 }
 0x2ca   :  { %v5632_v8 = vadd.f32 %v3137_v10, %v1886_v48  ;;  %v1850_v44 = vmul.f32 %v4411_v43, %v6457_v5  ;;  %v1800_v3 = vmul.f32 1.442695, %v1742_v21  ;;  %v5639_v7 = vadd.f32 %v1602_v18, %v5072_v57  ;;  %4151 = vmatprep.mubr.msk.f32.mxu0 %vm63_vm0, %v1886_v48  ;;  %v5652_v48 = vpop.f32.mrb[46].mxu0 }
 0x2cb   :  { %v5642_v28 = vadd.f32 %v3140_v54, %v1889_v1  ;;  %v3139_v63 = vsel %vm5327_vm12, %v5499_v4, 0.0  ;;  %4420 = vpow2.f32 %v1802_v22  ;;  %v1745_v10 = vmul.f32 0.5, %v5628_v53  ;;  %4152 = vmatmul.mubr.msk.f32.gmra.mrb[70].mxu0 %vm63_vm0, %v1887_v26  ;;  %v4413_v15 = vpop.eup %4412  ;;  %v4109_v54 = vpop.f32.mrb[82].mxu1 }
 0x2cc   :  { %v1888_v41 = vadd.f32 %v1850_v44, %v1299_v62  ;;  %v1309_v50 = vadd.f32 %v5501_v30, %v5281_v32  ;;  %4422 = vpow2.f32 %v1800_v3  ;;  %v1744_v18 = vmul.f32 0.5, %v5639_v7  ;;  %v4415_v21 = vpop.eup %4414  ;;  %v5664_v30 = vpop.f32.mrb[47].mxu0 }
 0x2cd   :  { %6458 = vst [vmem:[#allocation17_spill] sm:$0xff] %v5642_v28  ;;  %v6459_v4 = vsel %vm4544_vm3, %v5240_v25, 0.0  ;;  %v3142_v26 = vsel %vm5327_vm12, %v5523_v23, 0.0  ;;  %v1806_v62 = vmul.f32 1.442695, %v1745_v10  ;;  %v5662_v22 = vadd.f32 %v4106_v2, %v5072_v57  ;;  %v1622_v3 = vpop.f32.mrb[83].mxu1 }
 0x2ce   :  { %v1853_v43 = vmul.f32 %v4413_v15, %v6459_v4  ;;  %v5666_v5 = vadd.f32 %v3139_v63, %v1888_v41  ;;  %v6460_v44 = vsel %vm4544_vm3, %v5232_v45, 0.0  ;;  %v3141_v25 = vsel %vm5327_vm12, %v5532_v47, 0.0  ;;  %4154 = vmatprep.mubr.msk.f32.mxu0 %vm63_vm0, %v1888_v41 }
 0x2cf   :  { %v1852_v28 = vmul.f32 %v4415_v21, %v6460_v44  ;;  %v1804_v15 = vmul.f32 1.442695, %v1744_v18  ;;  %v1324_v2 = vadd.f32 %v5525_v56, %v5281_v32  ;;  %4424 = vpow2.f32 %v1806_v62  ;;  %4155 = vmatmul.mubr.msk.f32.gmra.mrb[72].mxu0 %vm63_vm0, %v1889_v1  ;;  %v4417_v10 = vpop.eup %4416  ;;  %v5685_v18 = vpop.f32.mrb[48].mxu0 }
 0x2d0   :  { %v1891_v23 = vadd.f32 %v1853_v43, %v1314_v38  ;;  %v1747_v63 = vmul.f32 0.5, %v5662_v22  ;;  %v1319_v45 = vadd.f32 %v5534_v60, %v5281_v32  ;;  %v5683_v47 = vadd.f32 %v1612_v40, %v5072_v57  ;;  %v4112_v38 = vpop.f32.mrb[84].mxu1  ;;  %v5696_v60 = vpop.f32.mrb[49].mxu0 }
 0x2d1   :  { %v1890_v4 = vadd.f32 %v1852_v28, %v1309_v50  ;;  %4426 = vpow2.f32 %v1804_v15  ;;  %v4419_v41 = vpop.eup %4418  ;;  %v6461_v56 = vsel %vm4544_vm3, %v5261_v58, 0.0  ;;  %v5694_v28 = vadd.f32 %v4109_v54, %v5072_v57  ;;  %v1632_v50 = vpop.f32.mrb[85].mxu1 }
 0x2d2   :  { %v5687_v21 = vadd.f32 %v3142_v26, %v1891_v23  ;;  %v1855_v1 = vmul.f32 %v4417_v10, %v6461_v56  ;;  %v1810_v43 = vmul.f32 1.442695, %v1747_v63  ;;  %v3144_v62 = vsel %vm5327_vm12, %v5555_v52, 0.0 }
 0x2d3   :  { %v5698_v40 = vadd.f32 %v3141_v25, %v1890_v4  ;;  %v6462_v26 = vsel %vm4544_vm3, %v5253_v24, 0.0  ;;  %v1746_v58 = vmul.f32 0.5, %v5683_v47  ;;  %4157 = vmatprep.mubr.msk.f32.mxu0 %vm63_vm0, %v1890_v4  ;;  %v3143_v15 = vsel %vm5327_vm12, %v5567_v29, 0.0 }
 0x2d4   :  { %v1854_v44 = vmul.f32 %v4419_v41, %v6462_v26  ;;  %v1893_v54 = vadd.f32 %v1855_v1, %v1324_v2  ;;  %4428 = vpow2.f32 %v1810_v43  ;;  %v1749_v25 = vmul.f32 0.5, %v5694_v28  ;;  %4158 = vmatmul.mubr.msk.f32.gmra.mrb[74].mxu0 %vm63_vm0, %v1891_v23  ;;  %v5719_v41 = vpop.f32.mrb[50].mxu0  ;;  %v4115_v2 = vpop.f32.mrb[86].mxu1 }
 0x2d5   :  { %v1334_v63 = vadd.f32 %v5557_v59, %v5281_v32  ;;  %v1808_v24 = vmul.f32 1.442695, %v1746_v58  ;;  %v5717_v10 = vadd.f32 %v1622_v3, %v5072_v57  ;;  %v4421_v4 = vpop.eup %4420  ;;  %v1329_v29 = vadd.f32 %v5569_v34, %v5281_v32  ;;  %v1642_v59 = vpop.f32.mrb[87].mxu1 }
 0x2d6   :  { %v1892_v52 = vadd.f32 %v1854_v44, %v1319_v45  ;;  %v5721_v56 = vadd.f32 %v3144_v62, %v1893_v54  ;;  %v1814_v1 = vmul.f32 1.442695, %v1749_v25  ;;  %v5726_v23 = vadd.f32 %v4112_v38, %v5072_v57  ;;  %v5728_v45 = vpop.f32.mrb[51].mxu0  ;;  %v4423_v43 = vpop.eup %4422 }
 0x2d7   :  { %v6463_v3 = vsel %vm4544_vm3, %v5289_v9, 0.0  ;;  %4430 = vpow2.f32 %v1808_v24  ;;  %v1748_v62 = vmul.f32 0.5, %v5717_v10  ;;  %v3146_v34 = vsel %vm5327_vm12, %v5594_v35, 0.0  ;;  %v5752_v35 = vpop.f32.mrb[52].mxu0 }
 0x2d8   :  { %v5730_v26 = vadd.f32 %v3143_v15, %v1892_v52  ;;  %v1857_v44 = vmul.f32 %v4421_v4, %v6463_v3  ;;  %4160 = vmatprep.mubr.msk.f32.mxu0 %vm63_vm0, %v1892_v52  ;;  %v6464_v38 = vsel %vm4544_vm3, %v5275_v11, 0.0  ;;  %4432 = vpow2.f32 %v1814_v1  ;;  %v4118_v4 = vpop.f32.mrb[88].mxu1 }
 0x2d9   :  { %v1856_v58 = vmul.f32 %v4423_v43, %v6464_v38  ;;  %v1751_v15 = vmul.f32 0.5, %v5726_v23  ;;  %4161 = vmatmul.mubr.msk.f32.gmra.mrb[76].mxu0 %vm63_vm0, %v1893_v54  ;;  %v3145_v25 = vsel %vm5327_vm12, %v5606_v51, 0.0  ;;  %v1344_v52 = vadd.f32 %v5587_v49, %v5281_v32  ;;  %v4425_v3 = vpop.eup %4424 }
 0x2da   :  { %v1895_v9 = vadd.f32 %v1857_v44, %v1334_v63  ;;  %v1812_v24 = vmul.f32 1.442695, %v1748_v62  ;;  %v1339_v1 = vadd.f32 %v5597_v19, %v5281_v32  ;;  %v5757_v54 = vadd.f32 %v1632_v50, %v5072_v57  ;;  %v5759_v63 = vpop.f32.mrb[53].mxu0  ;;  %v1652_v44 = vpop.f32.mrb[89].mxu1 }
 0x2db   :  { %v1894_v11 = vadd.f32 %v1856_v58, %v1329_v29  ;;  %v1818_v43 = vmul.f32 1.442695, %v1751_v15  ;;  %v4427_v51 = vpop.eup %4426  ;;  %v6465_v49 = vsel %vm4544_vm3, %v5310_v17, 0.0  ;;  %v5768_v29 = vadd.f32 %v4115_v2, %v5072_v57 }
 0x2dc   :  { %v5761_v38 = vadd.f32 %v3146_v34, %v1895_v9  ;;  %v1859_v62 = vmul.f32 %v4425_v3, %v6465_v49  ;;  %4434 = vpow2.f32 %v1812_v24  ;;  %v6466_v50 = vsel %vm4544_vm3, %v5297_v31, 0.0  ;;  %v5786_v31 = vpop.f32.mrb[54].mxu0  ;;  %v4121_v24 = vpop.f32.mrb[90].mxu1 }
 0x2dd   :  { %v5770_v19 = vadd.f32 %v3145_v25, %v1894_v11  ;;  %v1858_v58 = vmul.f32 %v4427_v51, %v6466_v50  ;;  %4436 = vpow2.f32 %v1818_v43  ;;  %v1750_v34 = vmul.f32 0.5, %v5757_v54  ;;  %4163 = vmatprep.mubr.msk.f32.mxu0 %vm63_vm0, %v1894_v11  ;;  %v1662_v49 = vpop.f32.mrb[91].mxu1 }
 0x2de   :  { %v1897_v15 = vadd.f32 %v1859_v62, %v1344_v52  ;;  %v3148_v17 = vsel %vm5327_vm12, %v5628_v53, 0.0  ;;  %v3147_v2 = vsel %vm5327_vm12, %v5639_v7, 0.0  ;;  %v1753_v25 = vmul.f32 0.5, %v5768_v29  ;;  %4164 = vmatmul.mubr.msk.f32.gmra.mrb[78].mxu0 %vm63_vm0, %v1895_v9  ;;  %v4429_v3 = vpop.eup %4428  ;;  %v5793_v53 = vpop.f32.mrb[55].mxu0 }
 0x2df   :  { %v1896_v43 = vadd.f32 %v1858_v58, %v1339_v1  ;;  %v1354_v52 = vadd.f32 %v5623_v27, %v5281_v32  ;;  %v1816_v11 = vmul.f32 1.442695, %v1750_v34  ;;  %v5791_v51 = vadd.f32 %v1642_v59, %v5072_v57 }
 0x2e0   :  { %v5795_v7 = vadd.f32 %v3148_v17, %v1897_v15  ;;  %v6468_v9 = vsel %vm4544_vm3, %v5337_v6, 0.0  ;;  %v1349_v1 = vadd.f32 %v5630_v61, %v5281_v32  ;;  %v1822_v50 = vmul.f32 1.442695, %v1753_v25  ;;  %v4124_v25 = vpop.f32.mrb[92].mxu1 }
 0x2e1   :  { %v1861_v62 = vmul.f32 %v4429_v3, %v6468_v9  ;;  %v5803_v58 = vadd.f32 %v3147_v2, %v1896_v43  ;;  %v3150_v27 = vsel %vm5327_vm12, %v5662_v22, 0.0  ;;  %4438 = vpow2.f32 %v1816_v11  ;;  %4166 = vmatprep.mubr.msk.f32.mxu0 %vm63_vm0, %v1896_v43  ;;  %v4431_v34 = vpop.eup %4430  ;;  %v5816_v2 = vpop.f32.mrb[56].mxu0 }
 0x2e2   :  { %6467 = vst [vmem:[#allocation18_spill] sm:$0xff] %v5795_v7  ;;  %v1752_v59 = vmul.f32 0.5, %v5791_v51  ;;  %v1364_v6 = vadd.f32 %v5652_v48, %v5281_v32  ;;  %4440 = vpow2.f32 %v1822_v50  ;;  %v5813_v61 = vadd.f32 %v4118_v4, %v5072_v57  ;;  %4167 = vmatmul.mubr.msk.f32.gmra.mrb[80].mxu0 %vm63_vm0, %v1897_v15  ;;  %v4433_v22 = vpop.eup %4432  ;;  %v5828_v4 = vpop.f32.mrb[57].mxu0 }
 0x2e3   :  { %6469 = vst [vmem:[#allocation19_spill] sm:$0xff] %v5803_v58  ;;  %v1899_v17 = vadd.f32 %v1861_v62, %v1354_v52  ;;  %v6470_v3 = vsel %vm4544_vm3, %v5318_v36, 0.0  ;;  %v3149_v52 = vsel %vm5327_vm12, %v5683_v47, 0.0  ;;  %v5826_v11 = vadd.f32 %v1652_v44, %v5072_v57  ;;  %v1672_v15 = vpop.f32.mrb[93].mxu1  ;;  %v6472_v62 = vld [vmem:[#allocation13_spill] sm:$0xff] }
 0x2e4   :  { %v1860_v43 = vmul.f32 %v4431_v34, %v6470_v3  ;;  %v1820_v48 = vmul.f32 1.442695, %v1752_v59  ;;  %v6473_v50 = vsel %vm4544_vm3, %v6472_v62, 0.0  ;;  %v3152_v36 = vsel %vm5327_vm12, %v5694_v28, 0.0 }
 0x2e5   :  { %v5830_v9 = vadd.f32 %v3150_v27, %v1899_v17  ;;  %v1863_v58 = vmul.f32 %v4433_v22, %v6473_v50  ;;  %v1755_v47 = vmul.f32 0.5, %v5813_v61  ;;  %v1359_v44 = vadd.f32 %v5664_v30, %v5281_v32 }
 0x2e6   :  { %v1898_v59 = vadd.f32 %v1860_v43, %v1349_v1  ;;  %4442 = vpow2.f32 %v1820_v48  ;;  %v1754_v34 = vmul.f32 0.5, %v5826_v11  ;;  %v4435_v27 = vpop.eup %4434  ;;  %v5846_v22 = vadd.f32 %v4121_v24, %v5072_v57  ;;  %v6474_v1 = vld [vmem:[#allocation12_spill] sm:$0xff] }
 0x2e7   :  { %6471 = vst [vmem:[#allocation20_spill] sm:$0xff] %v5830_v9  ;;  %v1901_v3 = vadd.f32 %v1863_v58, %v1364_v6  ;;  %v1374_v9 = vadd.f32 %v5685_v18, %v5281_v32  ;;  %v1826_v62 = vmul.f32 1.442695, %v1755_v47  ;;  %v4437_v50 = vpop.eup %4436  ;;  %v6475_v43 = vsel %vm4544_vm3, %v6474_v1, 0.0  ;;  %v6476_v18 = vld [vmem:[#allocation2_spill] sm:$0xff] }
 0x2e8   :  { %v5848_v28 = vadd.f32 %v3149_v52, %v1898_v59  ;;  %v1862_v30 = vmul.f32 %v4435_v27, %v6475_v43  ;;  %v1824_v48 = vmul.f32 1.442695, %v1754_v34  ;;  %v5855_v7 = vadd.f32 %v1662_v49, %v5072_v57  ;;  %4169 = vmatprep.mubr.msk.f32.mxu0 %vm63_vm0, %v1898_v59  ;;  %v4485_v47 = vld [vmem:[%s6407_s0 + $0xe0] sm:$0xff] }
 0x2e9   :  { %v5858_v58 = vadd.f32 %v3152_v36, %v1901_v3  ;;  %v6477_v24 = vsel %vm4544_vm3, %v6476_v18, 0.0  ;;  %4444 = vpow2.f32 %v1826_v62  ;;  %v1757_v52 = vmul.f32 0.5, %v5846_v22  ;;  %4170 = vmatmul.mubr.msk.f32.gmra.mrb[82].mxu0 %vm63_vm0, %v1899_v17 }
 0x2ea   :  { %v1865_v6 = vmul.f32 %v4437_v50, %v6477_v24  ;;  %v1712_v49 = vsel %vm4544_vm3, %v4485_v47, 0.0  ;;  %v1900_v59 = vadd.f32 %v1862_v30, %v1359_v44  ;;  %4446 = vpow2.f32 %v1824_v48 }
 0x2eb   :  { %v1756_v36 = vmul.f32 0.5, %v5855_v7  ;;  %v3151_v34 = vsel %vm5327_vm12, %v5717_v10, 0.0  ;;  %v3154_v17 = vsel %vm5327_vm12, %v5726_v23, 0.0  ;;  %v1830_v62 = vmul.f32 1.442695, %v1757_v52  ;;  %v4439_v50 = vpop.eup %4438 }
 0x2ec   :  { %v1903_v27 = vadd.f32 %v1865_v6, %v1374_v9  ;;  %v5878_v1 = vadd.f32 %v3151_v34, %v1900_v59  ;;  %v1369_v43 = vadd.f32 %v5696_v60, %v5281_v32  ;;  %v5883_v30 = vadd.f32 %v4124_v25, %v5072_v57  ;;  %4172 = vmatprep.mubr.msk.f32.mxu0 %vm63_vm0, %v1900_v59  ;;  %v4441_v48 = vpop.eup %4440  ;;  %v6478_v60 = vld [vmem:[#allocation4_spill] sm:$0xff]  ;;  %v6480_v34 = vld [vmem:[#allocation3_spill] sm:$0xff] }
 0x2ed   :  { %v1828_v44 = vmul.f32 1.442695, %v1756_v36  ;;  %v1864_v9 = vmul.f32 %v4439_v50, %v1712_v49  ;;  %4448 = vpow2.f32 %v1830_v62  ;;  %v5889_v23 = vadd.f32 %v1672_v15, %v5072_v57  ;;  %4173 = vmatmul.mubr.msk.f32.gmra.mrb[84].mxu0 %vm63_vm0, %v1901_v3 }
 0x2ee   :  { %v5886_v10 = vadd.f32 %v3154_v17, %v1903_v27  ;;  %v1384_v18 = vadd.f32 %v5719_v41, %v5281_v32  ;;  %v6479_v25 = vsel %vm4544_vm3, %v6478_v60, 0.0  ;;  %v1759_v6 = vmul.f32 0.5, %v5883_v30 }
 0x2ef   :  { %v1867_v24 = vmul.f32 %v4441_v48, %v6479_v25  ;;  %4450 = vpow2.f32 %v1828_v44  ;;  %v1902_v52 = vadd.f32 %v1864_v9, %v1369_v43  ;;  %v1758_v47 = vmul.f32 0.5, %v5889_v23  ;;  %v6482_v9 = vld [vmem:[#allocation6_spill] sm:$0xff] }
 0x2f0   :  { %v4443_v49 = vpop.eup %4442  ;;  %v3153_v57 = vsel %vm5327_vm12, %v5757_v54, 0.0  ;;  %v3156_v41 = vsel %vm5327_vm12, %v5768_v29, 0.0  ;;  %v1834_v3 = vmul.f32 1.442695, %v1759_v6  ;;  %v1379_v36 = vadd.f32 %v5728_v45, %v5281_v32 }
 0x2f1   :  { %v1905_v15 = vadd.f32 %v1867_v24, %v1384_v18  ;;  %v5906_v59 = vadd.f32 %v3153_v57, %v1902_v52  ;;  %v6481_v17 = vsel %vm4544_vm3, %v6480_v34, 0.0  ;;  %v1832_v50 = vmul.f32 1.442695, %v1758_v47  ;;  %4175 = vmatprep.mubr.msk.f32.mxu0 %vm63_vm0, %v1902_v52  ;;  %v6484_v24 = vld [vmem:[#allocation5_spill] sm:$0xff] }
 0x2f2   :  { %v1866_v62 = vmul.f32 %v4443_v49, %v6481_v17  ;;  %4452 = vpow2.f32 %v1834_v3  ;;  %4176 = vmatmul.mubr.msk.f32.gmra.mrb[86].mxu0 %vm63_vm0, %v1903_v27  ;;  %v3155_v45 = vsel %vm5327_vm12, %v5791_v51, 0.0  ;;  %v1394_v48 = vadd.f32 %v5752_v35, %v5281_v32 }
 0x2f3   :  { %v5915_v54 = vadd.f32 %v3156_v41, %v1905_v15  ;;  %v4445_v29 = vpop.eup %4444  ;;  %4454 = vpow2.f32 %v1832_v50  ;;  %v6483_v18 = vsel %vm4544_vm3, %v6482_v9, 0.0  ;;  %v1389_v27 = vadd.f32 %v5759_v63, %v5281_v32 }
 0x2f4   :  { %v1904_v43 = vadd.f32 %v1866_v62, %v1379_v36  ;;  %v4447_v44 = vpop.eup %4446  ;;  %v1869_v60 = vmul.f32 %v4445_v29, %v6483_v18  ;;  %v6485_v6 = vsel %vm4544_vm3, %v6484_v24, 0.0  ;;  %v3158_v47 = vsel %vm5327_vm12, %v5813_v61, 0.0  ;;  %v6486_v36 = vld [vmem:[#allocation8_spill] sm:$0xff]  ;;  %v6488_v62 = vld [vmem:[#allocation7_spill] sm:$0xff] }
 0x2f5   :  { %v1868_v52 = vmul.f32 %v4447_v44, %v6485_v6  ;;  %v3157_v63 = vsel %vm5327_vm12, %v5826_v11, 0.0  ;;  %v1404_v3 = vadd.f32 %v5786_v31, %v5281_v32  ;;  %v1399_v61 = vadd.f32 %v5793_v53, %v5281_v32  ;;  %v6492_v6 = vld [vmem:[#allocation9_spill] sm:$0xff] }
 0x2f6   :  { %v5927_v25 = vadd.f32 %v3155_v45, %v1904_v43  ;;  %4178 = vmatprep.mubr.msk.f32.mxu0 %vm63_vm0, %v1904_v43  ;;  %v1907_v51 = vadd.f32 %v1869_v60, %v1394_v48  ;;  %v6489_v50 = vsel %vm4544_vm3, %v6488_v62, 0.0  ;;  %v3160_v31 = vsel %vm5327_vm12, %v5846_v22, 0.0  ;;  %v6490_v60 = vld [vmem:[#allocation10_spill] sm:$0xff] }
 0x2f7   :  { %4179 = vmatmul.mubr.msk.f32.gmra.mrb[88].mxu0 %vm63_vm0, %v1905_v15  ;;  %v4449_v35 = vpop.eup %4448  ;;  %v1906_v49 = vadd.f32 %v1868_v52, %v1389_v27  ;;  %v6487_v15 = vsel %vm4544_vm3, %v6486_v36, 0.0  ;;  %v3159_v53 = vsel %vm5327_vm12, %v5855_v7, 0.0  ;;  %v1414_v18 = vadd.f32 %v5816_v2, %v5281_v32  ;;  %v6013_v36 = vld [vmem:[%s6408_s2] sm:$0xff] }
 0x2f8   :  { %v5940_v41 = vadd.f32 %v3158_v47, %v1907_v51  ;;  %v1871_v34 = vmul.f32 %v4449_v35, %v6487_v15  ;;  %v6491_v27 = vsel %vm4544_vm3, %v6490_v60, 0.0  ;;  %v1409_v22 = vadd.f32 %v5828_v4, %v5281_v32  ;;  %v3530_v4 = vld [vmem:[%s6406_s1 + $0xc8] sm:$0xff] }
 0x2f9   :  { %v4451_v57 = vpop.eup %4450  ;;  %v5951_v17 = vadd.f32 %v3157_v63, %v1906_v49  ;;  %4181 = vmatprep.mubr.msk.f32.mxu0 %vm63_vm0, %v1906_v49  ;;  %v6493_v7 = vsel %vm4544_vm3, %v6492_v6, 0.0  ;;  %v3162_v2 = vsel %vm5327_vm12, %v5883_v30, 0.0  ;;  %v3161_v49 = vsel %vm5327_vm12, %v5889_v23, 0.0  ;;  %v3531_v30 = vld [vmem:[%s6406_s1 + $0xd0] sm:$0xff]  ;;  %v3532_v23 = vld [vmem:[%s6406_s1 + $0xd8] sm:$0xff]  ;;  %v6494_v63 = vld [vmem:[#allocation11_spill] sm:$0xff] }
 0x2fa   :  { %v1870_v29 = vmul.f32 %v4451_v57, %v6489_v50  ;;  %v1909_v11 = vadd.f32 %v1871_v34, %v1404_v3  ;;  %v4368_v20 = vpack.c.bf16 %v3530_v4, %v3529_v14  ;;  %v4372_v57 = vpack.c.bf16 %v3532_v23, %v3531_v30 }
 0x2fb   :  { %4182 = vmatmul.mubr.msk.f32.gmra.mrb[90].mxu0 %vm63_vm0, %v1907_v51  ;;  %v1919_v3 = vsub.s32 4, %v6494_v63 }
 0x2fc   :  { %v1908_v43 = vadd.f32 %v1870_v29, %v1399_v61  ;;  %v4453_v44 = vpop.eup %4452  ;;  %v5964_v45 = vadd.f32 %v3160_v31, %v1909_v11  ;;  %4369 = vmatprep.subr.bf16.mxu0 %v4368_v20 }
 0x2fd   :  { %v4455_v48 = vpop.eup %4454  ;;  %v1873_v24 = vmul.f32 %v4453_v44, %v6491_v27  ;;  %4371 = vmatpush3.bf16.msra.mxu0 %v4368_v20  ;;  %v6016_v15 = vrot.slane %v6013_v36, %v1919_v3 }
 0x2fe   :  { %v5969_v9 = vadd.f32 %v3159_v53, %v1908_v43  ;;  %4184 = vmatprep.mubr.msk.f32.mxu0 %vm63_vm0, %v1908_v43  ;;  %v1872_v52 = vmul.f32 %v4455_v48, %v6493_v7  ;;  %4373 = vmatprep.subr.bf16.mxu0 %v4372_v57 }
 0x2ff   :  { %4185 = vmatmul.mubr.msk.f32.gmra.mrb[92].mxu0 %vm63_vm0, %v1909_v11  ;;  %v1911_v51 = vadd.f32 %v1873_v24, %v1414_v18 }
 0x300   :  { %v1910_v35 = vadd.f32 %v1872_v52, %v1409_v22 }
 0x301   :  { %v5988_v47 = vadd.f32 %v3162_v2, %v1911_v51  ;;  %4375 = vmatpush3.bf16.msra.mxu0 %v4372_v57 }
 0x302   :  { %v5993_v32 = vadd.f32 %v3161_v49, %v1910_v35  ;;  %4187 = vmatprep.mubr.msk.f32.mxu0 %vm63_vm0, %v1910_v35 }
 0x303   :  { %4188 = vmatmul.mubr.msk.f32.gmra.mrb[94].mxu0 %vm63_vm0, %v1911_v51 }
 0x380   :  { %v4135_v34 = vpop.f32.mrb[58].mxu0 }
 0x381   :  { %v2107_v61 = vadd.f32 %v4135_v34, %v6016_v15  ;;  %v2101_v62 = vpop.f32.mrb[59].mxu0 }
 0x382   :  { %v2102_v50 = vadd.f32 %v2101_v62, %v6016_v15 }
 0x383   :  { %v2291_v31 = vmax.f32 %v2107_v61, 0.0 }
 0x384   :  { %v2290_v29 = vmax.f32 %v2102_v50, 0.0  ;;  %v4138_v11 = vpop.f32.mrb[60].mxu0 }
 0x385   :  { %v2117_v43 = vadd.f32 %v4138_v11, %v6016_v15  ;;  %v2111_v44 = vpop.f32.mrb[61].mxu0 }
 0x386   :  { %v2112_v53 = vadd.f32 %v2111_v44, %v6016_v15  ;;  %4198 = vmatprep.mubr.msk.f32.mxu1 %vm63_vm0, %v2290_v29 }
 0x387   :  { %4199 = vmatmul.mubr.msk.f32.vlgmr.msra.gmra.mrb[94].mxu1 %vm63_vm0, %v2291_v31  ;;  %v2293_v60 = vmax.f32 %v2117_v43, 0.0 }
 0x388   :  { %v2292_v48 = vmax.f32 %v2112_v53, 0.0 }
 0x389   :  { %v4141_v18 = vpop.f32.mrb[62].mxu0 }
 0x38a   :  { %v2127_v27 = vadd.f32 %v4141_v18, %v6016_v15  ;;  %v2121_v24 = vpop.f32.mrb[63].mxu0  ;;  %4201 = vmatprep.mubr.msk.f32.mxu1 %vm63_vm0, %v2292_v48 }
 0x38b   :  { %v2122_v22 = vadd.f32 %v2121_v24, %v6016_v15  ;;  %4202 = vmatmul.mubr.msk.f32.gmra.mrb[96].mxu1 %vm63_vm0, %v2293_v60 }
 0x38c   :  { %v2295_v52 = vmax.f32 %v2127_v27, 0.0 }
 0x38d   :  { %v2294_v6 = vmax.f32 %v2122_v22, 0.0  ;;  %v4144_v7 = vpop.f32.mrb[64].mxu0 }
 0x38e   :  { %v2137_v51 = vadd.f32 %v4144_v7, %v6016_v15  ;;  %v2131_v2 = vpop.f32.mrb[65].mxu0 }
 0x38f   :  { %v2132_v35 = vadd.f32 %v2131_v2, %v6016_v15  ;;  %4204 = vmatprep.mubr.msk.f32.mxu1 %vm63_vm0, %v2294_v6 }
 0x390   :  { %4205 = vmatmul.mubr.msk.f32.gmra.mrb[98].mxu1 %vm63_vm0, %v2295_v52  ;;  %v2297_v4 = vmax.f32 %v2137_v51, 0.0 }
 0x391   :  { %v2296_v49 = vmax.f32 %v2132_v35, 0.0 }
 0x392   :  { %v4147_v14 = vpop.f32.mrb[66].mxu0 }
 0x393   :  { %v2147_v30 = vadd.f32 %v4147_v14, %v6016_v15  ;;  %v2141_v20 = vpop.f32.mrb[67].mxu0  ;;  %4207 = vmatprep.mubr.msk.f32.mxu1 %vm63_vm0, %v2296_v49 }
 0x394   :  { %v2142_v23 = vadd.f32 %v2141_v20, %v6016_v15  ;;  %4208 = vmatmul.mubr.msk.f32.gmra.mrb[100].mxu1 %vm63_vm0, %v2297_v4 }
 0x395   :  { %v2299_v3 = vmax.f32 %v2147_v30, 0.0 }
 0x396   :  { %v2298_v57 = vmax.f32 %v2142_v23, 0.0 }
 0x398   :  { %v4150_v34 = vpop.f32.mrb[68].mxu0  ;;  %4210 = vmatprep.mubr.msk.f32.mxu1 %vm63_vm0, %v2298_v57 }
 0x399   :  { %v2157_v61 = vadd.f32 %v4150_v34, %v6016_v15  ;;  %v2151_v62 = vpop.f32.mrb[69].mxu0  ;;  %4211 = vmatmul.mubr.msk.f32.gmra.mrb[102].mxu1 %vm63_vm0, %v2299_v3 }
 0x39a   :  { %v2152_v50 = vadd.f32 %v2151_v62, %v6016_v15 }
 0x39b   :  { %v2301_v11 = vmax.f32 %v2157_v61, 0.0 }
 0x39c   :  { %v2300_v29 = vmax.f32 %v2152_v50, 0.0 }
 0x39e   :  { %v4153_v31 = vpop.f32.mrb[70].mxu0  ;;  %4213 = vmatprep.mubr.msk.f32.mxu1 %vm63_vm0, %v2300_v29 }
 0x39f   :  { %v2167_v43 = vadd.f32 %v4153_v31, %v6016_v15  ;;  %v2161_v44 = vpop.f32.mrb[71].mxu0  ;;  %4214 = vmatmul.mubr.msk.f32.gmra.mrb[104].mxu1 %vm63_vm0, %v2301_v11 }
 0x3a0   :  { %v2162_v53 = vadd.f32 %v2161_v44, %v6016_v15 }
 0x3a1   :  { %v2303_v60 = vmax.f32 %v2167_v43, 0.0 }
 0x3a2   :  { %v2302_v48 = vmax.f32 %v2162_v53, 0.0  ;;  %v4156_v18 = vpop.f32.mrb[72].mxu0 }
 0x3a3   :  { %v2177_v27 = vadd.f32 %v4156_v18, %v6016_v15  ;;  %v2171_v24 = vpop.f32.mrb[73].mxu0 }
 0x3a4   :  { %v2172_v22 = vadd.f32 %v2171_v24, %v6016_v15  ;;  %4216 = vmatprep.mubr.msk.f32.mxu1 %vm63_vm0, %v2302_v48 }
 0x3a5   :  { %4217 = vmatmul.mubr.msk.f32.gmra.mrb[106].mxu1 %vm63_vm0, %v2303_v60  ;;  %v2305_v52 = vmax.f32 %v2177_v27, 0.0 }
 0x3a6   :  { %v2304_v6 = vmax.f32 %v2172_v22, 0.0 }
 0x3a7   :  { %v4159_v7 = vpop.f32.mrb[74].mxu0 }
 0x3a8   :  { %v2187_v51 = vadd.f32 %v4159_v7, %v6016_v15  ;;  %v2181_v2 = vpop.f32.mrb[75].mxu0  ;;  %4219 = vmatprep.mubr.msk.f32.mxu1 %vm63_vm0, %v2304_v6 }
 0x3a9   :  { %v2182_v35 = vadd.f32 %v2181_v2, %v6016_v15  ;;  %4220 = vmatmul.mubr.msk.f32.gmra.mrb[108].mxu1 %vm63_vm0, %v2305_v52 }
 0x3aa   :  { %v2307_v4 = vmax.f32 %v2187_v51, 0.0 }
 0x3ab   :  { %v2306_v49 = vmax.f32 %v2182_v35, 0.0 }
 0x3ac   :  { %v4162_v14 = vpop.f32.mrb[76].mxu0 }
 0x3ad   :  { %v2197_v30 = vadd.f32 %v4162_v14, %v6016_v15  ;;  %v2191_v20 = vpop.f32.mrb[77].mxu0  ;;  %4222 = vmatprep.mubr.msk.f32.mxu1 %vm63_vm0, %v2306_v49 }
 0x3ae   :  { %v2192_v23 = vadd.f32 %v2191_v20, %v6016_v15  ;;  %4223 = vmatmul.mubr.msk.f32.gmra.mrb[110].mxu1 %vm63_vm0, %v2307_v4 }
 0x3af   :  { %v2309_v3 = vmax.f32 %v2197_v30, 0.0 }
 0x3b0   :  { %v2308_v57 = vmax.f32 %v2192_v23, 0.0 }
 0x3b1   :  { %v4165_v34 = vpop.f32.mrb[78].mxu0 }
 0x3b2   :  { %v2207_v61 = vadd.f32 %v4165_v34, %v6016_v15  ;;  %v2201_v62 = vpop.f32.mrb[79].mxu0  ;;  %4225 = vmatprep.mubr.msk.f32.mxu1 %vm63_vm0, %v2308_v57 }
 0x3b3   :  { %v2202_v50 = vadd.f32 %v2201_v62, %v6016_v15  ;;  %4226 = vmatmul.mubr.msk.f32.gmra.mrb[112].mxu1 %vm63_vm0, %v2309_v3 }
 0x3b4   :  { %v2311_v31 = vmax.f32 %v2207_v61, 0.0 }
 0x3b5   :  { %v2310_v29 = vmax.f32 %v2202_v50, 0.0  ;;  %v4168_v11 = vpop.f32.mrb[80].mxu0 }
 0x3b6   :  { %v2217_v43 = vadd.f32 %v4168_v11, %v6016_v15  ;;  %v2211_v44 = vpop.f32.mrb[81].mxu0 }
 0x3b7   :  { %v2212_v53 = vadd.f32 %v2211_v44, %v6016_v15  ;;  %4228 = vmatprep.mubr.msk.f32.mxu1 %vm63_vm0, %v2310_v29 }
 0x3b8   :  { %4229 = vmatmul.mubr.msk.f32.gmra.mrb[114].mxu1 %vm63_vm0, %v2311_v31  ;;  %v2313_v18 = vmax.f32 %v2217_v43, 0.0 }
 0x3b9   :  { %v2312_v48 = vmax.f32 %v2212_v53, 0.0 }
 0x3bb   :  { %4231 = vmatprep.mubr.msk.f32.mxu1 %vm63_vm0, %v2312_v48 }
 0x3bc   :  { %v4171_v60 = vpop.f32.mrb[82].mxu0  ;;  %4232 = vmatmul.mubr.msk.f32.gmra.mrb[116].mxu1 %vm63_vm0, %v2313_v18 }
 0x3bd   :  { %v2227_v27 = vadd.f32 %v4171_v60, %v6016_v15  ;;  %v2221_v24 = vpop.f32.mrb[83].mxu0 }
 0x3be   :  { %v2222_v22 = vadd.f32 %v2221_v24, %v6016_v15 }
 0x3bf   :  { %v2315_v52 = vmax.f32 %v2227_v27, 0.0 }
 0x3c0   :  { %v2314_v6 = vmax.f32 %v2222_v22, 0.0  ;;  %v4174_v7 = vpop.f32.mrb[84].mxu0 }
 0x3c1   :  { %v2237_v51 = vadd.f32 %v4174_v7, %v6016_v15  ;;  %v2231_v2 = vpop.f32.mrb[85].mxu0 }
 0x3c2   :  { %v2232_v35 = vadd.f32 %v2231_v2, %v6016_v15  ;;  %4234 = vmatprep.mubr.msk.f32.mxu1 %vm63_vm0, %v2314_v6 }
 0x3c3   :  { %4235 = vmatmul.mubr.msk.f32.gmra.mrb[118].mxu1 %vm63_vm0, %v2315_v52  ;;  %v2317_v14 = vmax.f32 %v2237_v51, 0.0 }
 0x3c4   :  { %v2316_v49 = vmax.f32 %v2232_v35, 0.0 }
 0x3c5   :  { %v4177_v4 = vpop.f32.mrb[86].mxu0 }
 0x3c6   :  { %v2247_v30 = vadd.f32 %v4177_v4, %v6016_v15  ;;  %v2241_v20 = vpop.f32.mrb[87].mxu0  ;;  %4237 = vmatprep.mubr.msk.f32.mxu1 %vm63_vm0, %v2316_v49  ;;  %v2335_v4 = vsub.s32 5, %v6494_v63 }
 0x3c7   :  { %v2242_v23 = vadd.f32 %v2241_v20, %v6016_v15  ;;  %4238 = vmatmul.mubr.msk.f32.gmra.mrb[120].mxu1 %vm63_vm0, %v2317_v14 }
 0x3c8   :  { %v2319_v34 = vmax.f32 %v2247_v30, 0.0  ;;  %v6096_v30 = vrot.slane %v6013_v36, %v2335_v4 }
 0x3c9   :  { %v2318_v57 = vmax.f32 %v2242_v23, 0.0 }
 0x3ca   :  { %v4180_v3 = vpop.f32.mrb[88].mxu0 }
 0x3cb   :  { %v2257_v61 = vadd.f32 %v4180_v3, %v6016_v15  ;;  %v2251_v62 = vpop.f32.mrb[89].mxu0  ;;  %4240 = vmatprep.mubr.msk.f32.mxu1 %vm63_vm0, %v2318_v57 }
 0x3cc   :  { %v2252_v50 = vadd.f32 %v2251_v62, %v6016_v15  ;;  %4241 = vmatmul.mubr.msk.f32.gmra.mrb[122].mxu1 %vm63_vm0, %v2319_v34 }
 0x3cd   :  { %v2321_v31 = vmax.f32 %v2257_v61, 0.0 }
 0x3ce   :  { %v2320_v29 = vmax.f32 %v2252_v50, 0.0  ;;  %v4183_v11 = vpop.f32.mrb[90].mxu0 }
 0x3cf   :  { %v2267_v43 = vadd.f32 %v4183_v11, %v6016_v15  ;;  %v2261_v44 = vpop.f32.mrb[91].mxu0 }
 0x3d0   :  { %v2262_v53 = vadd.f32 %v2261_v44, %v6016_v15  ;;  %4243 = vmatprep.mubr.msk.f32.mxu1 %vm63_vm0, %v2320_v29 }
 0x3d1   :  { %4244 = vmatmul.mubr.msk.f32.gmra.mrb[124].mxu1 %vm63_vm0, %v2321_v31  ;;  %v2323_v60 = vmax.f32 %v2267_v43, 0.0 }
 0x3d2   :  { %v2322_v48 = vmax.f32 %v2262_v53, 0.0  ;;  %v4186_v18 = vpop.f32.mrb[92].mxu0 }
 0x3d3   :  { %v2277_v27 = vadd.f32 %v4186_v18, %v6016_v15  ;;  %v2271_v24 = vpop.f32.mrb[93].mxu0 }
 0x3d4   :  { %v2272_v22 = vadd.f32 %v2271_v24, %v6016_v15  ;;  %4246 = vmatprep.mubr.msk.f32.mxu1 %vm63_vm0, %v2322_v48 }
 0x3d5   :  { %4247 = vmatmul.mubr.msk.f32.gmra.mrb[126].mxu1 %vm63_vm0, %v2323_v60  ;;  %v2325_v7 = vmax.f32 %v2277_v27, 0.0 }
 0x3d6   :  { %v2324_v6 = vmax.f32 %v2272_v22, 0.0  ;;  %v4189_v52 = vpop.f32.mrb[94].mxu0 }
 0x3d7   :  { %v2287_v51 = vadd.f32 %v4189_v52, %v6016_v15  ;;  %v2281_v2 = vpop.f32.mrb[95].mxu0 }
 0x3d8   :  { %4249 = vmatprep.mubr.msk.f32.mxu1 %vm63_vm0, %v2324_v6  ;;  %v2282_v35 = vadd.f32 %v2281_v2, %v6016_v15 }
 0x3d9   :  { %4250 = vmatmul.mubr.msk.f32.gmra.mrb[128].mxu1 %vm63_vm0, %v2325_v7  ;;  %v2327_v14 = vmax.f32 %v2287_v51, 0.0 }
 0x3da   :  { %v2326_v49 = vmax.f32 %v2282_v35, 0.0 }
 0x3dc   :  { %4252 = vmatprep.mubr.msk.f32.mxu1 %vm63_vm0, %v2326_v49 }
 0x3dd   :  { %4253 = vmatmul.mubr.msk.f32.gmra.mrb[130].mxu1 %vm63_vm0, %v2327_v14 }
 0x45a   :  { %v4200_v20 = vpop.f32.mrb[94].mxu1 }
 0x45b   :  { %v2523_v23 = vadd.f32 %v4200_v20, %v6096_v30  ;;  %v2517_v57 = vpop.f32.mrb[95].mxu1 }
 0x45c   :  { %v2518_v3 = vadd.f32 %v2517_v57, %v6096_v30 }
 0x45d   :  { %v2707_v61 = vmax.f32 %v2523_v23, 0.0 }
 0x45e   :  { %v2706_v15 = vmax.f32 %v2518_v3, 0.0  ;;  %v4203_v34 = vpop.f32.mrb[96].mxu1 }
 0x45f   :  { %v2533_v62 = vadd.f32 %v4203_v34, %v6096_v30  ;;  %v2527_v50 = vpop.f32.mrb[97].mxu1 }
 0x460   :  { %v2528_v29 = vadd.f32 %v2527_v50, %v6096_v30  ;;  %4263 = vmatprep.mubr.msk.f32.mxu0 %vm63_vm0, %v2706_v15 }
 0x461   :  { %4264 = vmatmul.mubr.msk.f32.vlgmr.msra.gmra.mrb[96].mxu0 %vm63_vm0, %v2707_v61  ;;  %v2709_v43 = vmax.f32 %v2533_v62, 0.0 }
 0x462   :  { %v2708_v11 = vmax.f32 %v2528_v29, 0.0 }
 0x463   :  { %v4206_v31 = vpop.f32.mrb[98].mxu1 }
 0x464   :  { %v2543_v44 = vadd.f32 %v4206_v31, %v6096_v30  ;;  %v2537_v53 = vpop.f32.mrb[99].mxu1  ;;  %4266 = vmatprep.mubr.msk.f32.mxu0 %vm63_vm0, %v2708_v11 }
 0x465   :  { %v2538_v48 = vadd.f32 %v2537_v53, %v6096_v30  ;;  %4267 = vmatmul.mubr.msk.f32.gmra.mrb[98].mxu0 %vm63_vm0, %v2709_v43 }
 0x466   :  { %v2711_v27 = vmax.f32 %v2543_v44, 0.0 }
 0x467   :  { %v2710_v18 = vmax.f32 %v2538_v48, 0.0  ;;  %v4209_v60 = vpop.f32.mrb[100].mxu1 }
 0x468   :  { %v2553_v24 = vadd.f32 %v4209_v60, %v6096_v30  ;;  %v2547_v22 = vpop.f32.mrb[101].mxu1 }
 0x469   :  { %v2548_v6 = vadd.f32 %v2547_v22, %v6096_v30  ;;  %4269 = vmatprep.mubr.msk.f32.mxu0 %vm63_vm0, %v2710_v18 }
 0x46a   :  { %4270 = vmatmul.mubr.msk.f32.gmra.mrb[100].mxu0 %vm63_vm0, %v2711_v27  ;;  %v2713_v51 = vmax.f32 %v2553_v24, 0.0 }
 0x46b   :  { %v2712_v7 = vmax.f32 %v2548_v6, 0.0 }
 0x46c   :  { %v4212_v52 = vpop.f32.mrb[102].mxu1 }
 0x46d   :  { %v2563_v2 = vadd.f32 %v4212_v52, %v6096_v30  ;;  %v2557_v35 = vpop.f32.mrb[103].mxu1  ;;  %4272 = vmatprep.mubr.msk.f32.mxu0 %vm63_vm0, %v2712_v7 }
 0x46e   :  { %v2558_v49 = vadd.f32 %v2557_v35, %v6096_v30  ;;  %4273 = vmatmul.mubr.msk.f32.gmra.mrb[102].mxu0 %vm63_vm0, %v2713_v51 }
 0x46f   :  { %v2715_v4 = vmax.f32 %v2563_v2, 0.0 }
 0x470   :  { %v2714_v14 = vmax.f32 %v2558_v49, 0.0 }
 0x472   :  { %v4215_v20 = vpop.f32.mrb[104].mxu1  ;;  %4275 = vmatprep.mubr.msk.f32.mxu0 %vm63_vm0, %v2714_v14 }
 0x473   :  { %v2573_v23 = vadd.f32 %v4215_v20, %v6096_v30  ;;  %v2567_v57 = vpop.f32.mrb[105].mxu1  ;;  %4276 = vmatmul.mubr.msk.f32.gmra.mrb[104].mxu0 %vm63_vm0, %v2715_v4 }
 0x474   :  { %v2568_v3 = vadd.f32 %v2567_v57, %v6096_v30 }
 0x475   :  { %v2717_v34 = vmax.f32 %v2573_v23, 0.0 }
 0x476   :  { %v2716_v15 = vmax.f32 %v2568_v3, 0.0 }
 0x478   :  { %v4218_v61 = vpop.f32.mrb[106].mxu1  ;;  %4278 = vmatprep.mubr.msk.f32.mxu0 %vm63_vm0, %v2716_v15 }
 0x479   :  { %v2583_v62 = vadd.f32 %v4218_v61, %v6096_v30  ;;  %v2577_v50 = vpop.f32.mrb[107].mxu1  ;;  %4279 = vmatmul.mubr.msk.f32.gmra.mrb[106].mxu0 %vm63_vm0, %v2717_v34 }
 0x47a   :  { %v2578_v29 = vadd.f32 %v2577_v50, %v6096_v30 }
 0x47b   :  { %v2719_v43 = vmax.f32 %v2583_v62, 0.0 }
 0x47c   :  { %v2718_v11 = vmax.f32 %v2578_v29, 0.0  ;;  %v4221_v31 = vpop.f32.mrb[108].mxu1 }
 0x47d   :  { %v2593_v44 = vadd.f32 %v4221_v31, %v6096_v30  ;;  %v2587_v53 = vpop.f32.mrb[109].mxu1 }
 0x47e   :  { %v2588_v48 = vadd.f32 %v2587_v53, %v6096_v30  ;;  %4281 = vmatprep.mubr.msk.f32.mxu0 %vm63_vm0, %v2718_v11 }
 0x47f   :  { %4282 = vmatmul.mubr.msk.f32.gmra.mrb[108].mxu0 %vm63_vm0, %v2719_v43  ;;  %v2721_v27 = vmax.f32 %v2593_v44, 0.0 }
 0x480   :  { %v2720_v18 = vmax.f32 %v2588_v48, 0.0 }
 0x481   :  { %v4224_v60 = vpop.f32.mrb[110].mxu1 }
 0x482   :  { %v2603_v24 = vadd.f32 %v4224_v60, %v6096_v30  ;;  %v2597_v22 = vpop.f32.mrb[111].mxu1  ;;  %4284 = vmatprep.mubr.msk.f32.mxu0 %vm63_vm0, %v2720_v18 }
 0x483   :  { %v2598_v6 = vadd.f32 %v2597_v22, %v6096_v30  ;;  %4285 = vmatmul.mubr.msk.f32.gmra.mrb[110].mxu0 %vm63_vm0, %v2721_v27 }
 0x484   :  { %v2723_v51 = vmax.f32 %v2603_v24, 0.0 }
 0x485   :  { %v2722_v7 = vmax.f32 %v2598_v6, 0.0 }
 0x486   :  { %v4227_v52 = vpop.f32.mrb[112].mxu1 }
 0x487   :  { %v2613_v2 = vadd.f32 %v4227_v52, %v6096_v30  ;;  %v2607_v35 = vpop.f32.mrb[113].mxu1  ;;  %4287 = vmatprep.mubr.msk.f32.mxu0 %vm63_vm0, %v2722_v7 }
 0x488   :  { %v2608_v49 = vadd.f32 %v2607_v35, %v6096_v30  ;;  %4288 = vmatmul.mubr.msk.f32.gmra.mrb[112].mxu0 %vm63_vm0, %v2723_v51 }
 0x489   :  { %v2725_v4 = vmax.f32 %v2613_v2, 0.0 }
 0x48a   :  { %v2724_v14 = vmax.f32 %v2608_v49, 0.0 }
 0x48b   :  { %v4230_v20 = vpop.f32.mrb[114].mxu1 }
 0x48c   :  { %v2623_v23 = vadd.f32 %v4230_v20, %v6096_v30  ;;  %v2617_v57 = vpop.f32.mrb[115].mxu1  ;;  %4290 = vmatprep.mubr.msk.f32.mxu0 %vm63_vm0, %v2724_v14 }
 0x48d   :  { %v2618_v3 = vadd.f32 %v2617_v57, %v6096_v30  ;;  %4291 = vmatmul.mubr.msk.f32.gmra.mrb[114].mxu0 %vm63_vm0, %v2725_v4 }
 0x48e   :  { %v2727_v61 = vmax.f32 %v2623_v23, 0.0 }
 0x48f   :  { %v2726_v15 = vmax.f32 %v2618_v3, 0.0  ;;  %v4233_v34 = vpop.f32.mrb[116].mxu1 }
 0x490   :  { %v2633_v62 = vadd.f32 %v4233_v34, %v6096_v30  ;;  %v2627_v50 = vpop.f32.mrb[117].mxu1 }
 0x491   :  { %v2628_v29 = vadd.f32 %v2627_v50, %v6096_v30  ;;  %4293 = vmatprep.mubr.msk.f32.mxu0 %vm63_vm0, %v2726_v15 }
 0x492   :  { %4294 = vmatmul.mubr.msk.f32.gmra.mrb[116].mxu0 %vm63_vm0, %v2727_v61  ;;  %v2729_v31 = vmax.f32 %v2633_v62, 0.0 }
 0x493   :  { %v2728_v11 = vmax.f32 %v2628_v29, 0.0 }
 0x495   :  { %4296 = vmatprep.mubr.msk.f32.mxu0 %vm63_vm0, %v2728_v11 }
 0x496   :  { %v4236_v43 = vpop.f32.mrb[118].mxu1  ;;  %4297 = vmatmul.mubr.msk.f32.gmra.mrb[118].mxu0 %vm63_vm0, %v2729_v31 }
 0x497   :  { %v2643_v44 = vadd.f32 %v4236_v43, %v6096_v30  ;;  %v2637_v53 = vpop.f32.mrb[119].mxu1 }
 0x498   :  { %v2638_v48 = vadd.f32 %v2637_v53, %v6096_v30 }
 0x499   :  { %v2731_v27 = vmax.f32 %v2643_v44, 0.0 }
 0x49a   :  { %v2730_v18 = vmax.f32 %v2638_v48, 0.0  ;;  %v4239_v60 = vpop.f32.mrb[120].mxu1 }
 0x49b   :  { %v2653_v24 = vadd.f32 %v4239_v60, %v6096_v30  ;;  %v2647_v22 = vpop.f32.mrb[121].mxu1 }
 0x49c   :  { %v2648_v6 = vadd.f32 %v2647_v22, %v6096_v30  ;;  %4299 = vmatprep.mubr.msk.f32.mxu0 %vm63_vm0, %v2730_v18 }
 0x49d   :  { %4300 = vmatmul.mubr.msk.f32.gmra.mrb[120].mxu0 %vm63_vm0, %v2731_v27  ;;  %v2733_v52 = vmax.f32 %v2653_v24, 0.0 }
 0x49e   :  { %v2732_v7 = vmax.f32 %v2648_v6, 0.0 }
 0x49f   :  { %v4242_v51 = vpop.f32.mrb[122].mxu1 }
 0x4a0   :  { %v2663_v2 = vadd.f32 %v4242_v51, %v6096_v30  ;;  %v2657_v35 = vpop.f32.mrb[123].mxu1  ;;  %4302 = vmatprep.mubr.msk.f32.mxu0 %vm63_vm0, %v2732_v7  ;;  %v2751_v51 = vsub.s32 6, %v6494_v63 }
 0x4a1   :  { %v2658_v49 = vadd.f32 %v2657_v35, %v6096_v30  ;;  %4303 = vmatmul.mubr.msk.f32.gmra.mrb[122].mxu0 %vm63_vm0, %v2733_v52 }
 0x4a2   :  { %v2735_v20 = vmax.f32 %v2663_v2, 0.0  ;;  %v6176_v2 = vrot.slane %v6013_v36, %v2751_v51 }
 0x4a3   :  { %v2734_v14 = vmax.f32 %v2658_v49, 0.0 }
 0x4a4   :  { %v4245_v4 = vpop.f32.mrb[124].mxu1 }
 0x4a5   :  { %v2673_v23 = vadd.f32 %v4245_v4, %v6096_v30  ;;  %v2667_v57 = vpop.f32.mrb[125].mxu1  ;;  %4305 = vmatprep.mubr.msk.f32.mxu0 %vm63_vm0, %v2734_v14 }
 0x4a6   :  { %v2668_v3 = vadd.f32 %v2667_v57, %v6096_v30  ;;  %4306 = vmatmul.mubr.msk.f32.gmra.mrb[124].mxu0 %vm63_vm0, %v2735_v20 }
 0x4a7   :  { %v2737_v61 = vmax.f32 %v2673_v23, 0.0 }
 0x4a8   :  { %v2736_v15 = vmax.f32 %v2668_v3, 0.0  ;;  %v4248_v34 = vpop.f32.mrb[126].mxu1 }
 0x4a9   :  { %v2683_v62 = vadd.f32 %v4248_v34, %v6096_v30  ;;  %v2677_v50 = vpop.f32.mrb[127].mxu1 }
 0x4aa   :  { %v2678_v29 = vadd.f32 %v2677_v50, %v6096_v30  ;;  %4308 = vmatprep.mubr.msk.f32.mxu0 %vm63_vm0, %v2736_v15 }
 0x4ab   :  { %4309 = vmatmul.mubr.msk.f32.gmra.mrb[126].mxu0 %vm63_vm0, %v2737_v61  ;;  %v2739_v43 = vmax.f32 %v2683_v62, 0.0 }
 0x4ac   :  { %v2738_v11 = vmax.f32 %v2678_v29, 0.0  ;;  %v4251_v31 = vpop.f32.mrb[128].mxu1 }
 0x4ad   :  { %v2693_v44 = vadd.f32 %v4251_v31, %v6096_v30  ;;  %v2687_v53 = vpop.f32.mrb[129].mxu1 }
 0x4ae   :  { %v2688_v48 = vadd.f32 %v2687_v53, %v6096_v30  ;;  %4311 = vmatprep.mubr.msk.f32.mxu0 %vm63_vm0, %v2738_v11 }
 0x4af   :  { %4312 = vmatmul.mubr.msk.f32.gmra.mrb[128].mxu0 %vm63_vm0, %v2739_v43  ;;  %v2741_v60 = vmax.f32 %v2693_v44, 0.0 }
 0x4b0   :  { %v2740_v18 = vmax.f32 %v2688_v48, 0.0  ;;  %v4254_v27 = vpop.f32.mrb[130].mxu1 }
 0x4b1   :  { %v2703_v24 = vadd.f32 %v4254_v27, %v6096_v30  ;;  %v2697_v22 = vpop.f32.mrb[131].mxu1 }
 0x4b2   :  { %4314 = vmatprep.mubr.msk.f32.mxu0 %vm63_vm0, %v2740_v18  ;;  %v2698_v6 = vadd.f32 %v2697_v22, %v6096_v30  ;;  %v6495_v30 = vld [vmem:[#allocation14_spill] sm:$0xff] }
 0x4b3   :  { %4315 = vmatmul.mubr.msk.f32.gmra.mrb[130].mxu0 %vm63_vm0, %v2741_v60  ;;  %v2743_v52 = vmax.f32 %v2703_v24, 0.0 }
 0x4b4   :  { %v2742_v7 = vmax.f32 %v2698_v6, 0.0  ;;  %v6496_v6 = vld [vmem:[#allocation15_spill] sm:$0xff] }
 0x4b6   :  { %4317 = vmatprep.mubr.msk.f32.mxu0 %vm63_vm0, %v2742_v7 }
 0x4b7   :  { %4318 = vmatmul.mubr.msk.f32.gmra.mrb[132].mxu0 %vm63_vm0, %v2743_v52 }
 0x534   :  { %v4265_v35 = vpop.f32.mrb[96].mxu0 }
 0x535   :  { %v2939_v49 = vadd.f32 %v4265_v35, %v6176_v2  ;;  %v2933_v14 = vpop.f32.mrb[97].mxu0 }
 0x536   :  { %v2934_v4 = vadd.f32 %v2933_v14, %v6176_v2 }
 0x537   :  { %v3202_v20 = vadd.f32 %v6495_v30, %v2939_v49  ;;  %v6497_v49 = vld [vmem:[#allocation16_spill] sm:$0xff] }
 0x538   :  { %v3201_v23 = vadd.f32 %v5413_v42, %v2934_v4  ;;  %v4268_v57 = vpop.f32.mrb[98].mxu0 }
 0x539   :  { %3240 = vst.msk [vmem:[%s6409_s3 + $0x8] sm:$0xff] %vm63_vm0, %v3202_v20  ;;  %v2949_v63 = vadd.f32 %v4268_v57, %v6176_v2  ;;  %v2943_v36 = vpop.f32.mrb[99].mxu0  ;;  %v6498_v57 = vld [vmem:[#allocation17_spill] sm:$0xff] }
 0x53a   :  { %3239 = vst.msk [vmem:[%s6409_s3] sm:$0xff] %vm63_vm0, %v3201_v23  ;;  %v2944_v3 = vadd.f32 %v2943_v36, %v6176_v2 }
 0x53b   :  { %v3204_v15 = vadd.f32 %v5436_v0, %v2949_v63 }
 0x53c   :  { %v3203_v42 = vadd.f32 %v5446_v37, %v2944_v3 }
 0x53d   :  { %v4271_v34 = vpop.f32.mrb[100].mxu0  ;;  %3242 = vst.msk [vmem:[%s6409_s3 + $0x18] sm:$0xff] %vm63_vm0, %v3204_v15 }
 0x53e   :  { %v2959_v61 = vadd.f32 %v4271_v34, %v6176_v2  ;;  %v2953_v62 = vpop.f32.mrb[101].mxu0  ;;  %3241 = vst.msk [vmem:[%s6409_s3 + $0x10] sm:$0xff] %vm63_vm0, %v3203_v42 }
 0x53f   :  { %v2954_v50 = vadd.f32 %v2953_v62, %v6176_v2 }
 0x540   :  { %v3206_v0 = vadd.f32 %v5469_v12, %v2959_v61 }
 0x541   :  { %v3205_v37 = vadd.f32 %v5478_v46, %v2954_v50  ;;  %v4274_v29 = vpop.f32.mrb[102].mxu0 }
 0x542   :  { %3244 = vst.msk [vmem:[%s6409_s3 + $0x28] sm:$0xff] %vm63_vm0, %v3206_v0  ;;  %v2969_v11 = vadd.f32 %v4274_v29, %v6176_v2  ;;  %v2963_v31 = vpop.f32.mrb[103].mxu0 }
 0x543   :  { %3243 = vst.msk [vmem:[%s6409_s3 + $0x20] sm:$0xff] %vm63_vm0, %v3205_v37  ;;  %v2964_v43 = vadd.f32 %v2963_v31, %v6176_v2 }
 0x544   :  { %v3208_v12 = vadd.f32 %v5503_v39, %v2969_v11 }
 0x545   :  { %v3207_v46 = vadd.f32 %v5511_v33, %v2964_v43 }
 0x546   :  { %v4277_v44 = vpop.f32.mrb[104].mxu0  ;;  %3246 = vst.msk [vmem:[%s6409_s3 + $0x38] sm:$0xff] %vm63_vm0, %v3208_v12 }
 0x547   :  { %v2979_v53 = vadd.f32 %v4277_v44, %v6176_v2  ;;  %v2973_v48 = vpop.f32.mrb[105].mxu0  ;;  %3245 = vst.msk [vmem:[%s6409_s3 + $0x30] sm:$0xff] %vm63_vm0, %v3207_v46 }
 0x548   :  { %v2974_v18 = vadd.f32 %v2973_v48, %v6176_v2  ;;  %v6500_v48 = vld [vmem:[#allocation19_spill] sm:$0xff] }
 0x549   :  { %v3210_v39 = vadd.f32 %v5536_v13, %v2979_v53  ;;  %v6499_v53 = vld [vmem:[#allocation18_spill] sm:$0xff] }
 0x54a   :  { %v3209_v33 = vadd.f32 %v5545_v55, %v2974_v18 }
 0x54b   :  { %3248 = vst.msk [vmem:[%s6409_s3 + $0x48] sm:$0xff] %vm63_vm0, %v3210_v39 }
 0x54c   :  { %3247 = vst.msk [vmem:[%s6409_s3 + $0x40] sm:$0xff] %vm63_vm0, %v3209_v33  ;;  %v4280_v60 = vpop.f32.mrb[106].mxu0 }
 0x54d   :  { %v2989_v27 = vadd.f32 %v4280_v60, %v6176_v2  ;;  %v2983_v24 = vpop.f32.mrb[107].mxu0 }
 0x54e   :  { %v2984_v22 = vadd.f32 %v2983_v24, %v6176_v2 }
 0x54f   :  { %v3212_v13 = vadd.f32 %v5571_v16, %v2989_v27  ;;  %v6501_v27 = vld [vmem:[#allocation20_spill] sm:$0xff] }
 0x550   :  { %v3211_v55 = vadd.f32 %v6496_v6, %v2984_v22 }
 0x551   :  { %3250 = vst.msk [vmem:[%s6409_s3 + $0x58] sm:$0xff] %vm63_vm0, %v3212_v13 }
 0x552   :  { %v4283_v7 = vpop.f32.mrb[108].mxu0  ;;  %3249 = vst.msk [vmem:[%s6409_s3 + $0x50] sm:$0xff] %vm63_vm0, %v3211_v55 }
 0x553   :  { %v2999_v52 = vadd.f32 %v4283_v7, %v6176_v2  ;;  %v2993_v51 = vpop.f32.mrb[109].mxu0 }
 0x554   :  { %v2994_v35 = vadd.f32 %v2993_v51, %v6176_v2 }
 0x555   :  { %v3214_v16 = vadd.f32 %v6497_v49, %v2999_v52 }
 0x556   :  { %v3213_v14 = vadd.f32 %v5632_v8, %v2994_v35  ;;  %v4286_v4 = vpop.f32.mrb[110].mxu0 }
 0x557   :  { %3252 = vst.msk [vmem:[%s6409_s3 + $0x68] sm:$0xff] %vm63_vm0, %v3214_v16  ;;  %v3009_v30 = vadd.f32 %v4286_v4, %v6176_v2  ;;  %v3003_v20 = vpop.f32.mrb[111].mxu0 }
 0x558   :  { %3251 = vst.msk [vmem:[%s6409_s3 + $0x60] sm:$0xff] %vm63_vm0, %v3213_v14  ;;  %v3004_v23 = vadd.f32 %v3003_v20, %v6176_v2 }
 0x559   :  { %v3216_v63 = vadd.f32 %v6498_v57, %v3009_v30 }
 0x55a   :  { %v3215_v8 = vadd.f32 %v5666_v5, %v3004_v23 }
 0x55b   :  { %v4289_v36 = vpop.f32.mrb[112].mxu0  ;;  %3254 = vst.msk [vmem:[%s6409_s3 + $0x78] sm:$0xff] %vm63_vm0, %v3216_v63 }
 0x55c   :  { %v3019_v3 = vadd.f32 %v4289_v36, %v6176_v2  ;;  %v3013_v15 = vpop.f32.mrb[113].mxu0  ;;  %3253 = vst.msk [vmem:[%s6409_s3 + $0x70] sm:$0xff] %vm63_vm0, %v3215_v8 }
 0x55d   :  { %v3014_v42 = vadd.f32 %v3013_v15, %v6176_v2 }
 0x55e   :  { %v3218_v34 = vadd.f32 %v5687_v21, %v3019_v3 }
 0x55f   :  { %v3217_v5 = vadd.f32 %v5698_v40, %v3014_v42 }
 0x560   :  { %v4292_v61 = vpop.f32.mrb[114].mxu0  ;;  %3256 = vst.msk [vmem:[%s6409_s3 + $0x88] sm:$0xff] %vm63_vm0, %v3218_v34 }
 0x561   :  { %v3029_v62 = vadd.f32 %v4292_v61, %v6176_v2  ;;  %v3023_v50 = vpop.f32.mrb[115].mxu0  ;;  %3255 = vst.msk [vmem:[%s6409_s3 + $0x80] sm:$0xff] %vm63_vm0, %v3217_v5 }
 0x562   :  { %v3024_v0 = vadd.f32 %v3023_v50, %v6176_v2 }
 0x563   :  { %v3220_v21 = vadd.f32 %v5721_v56, %v3029_v62 }
 0x564   :  { %v3219_v40 = vadd.f32 %v5730_v26, %v3024_v0 }
 0x565   :  { %3258 = vst.msk [vmem:[%s6409_s3 + $0x98] sm:$0xff] %vm63_vm0, %v3220_v21  ;;  %v4295_v37 = vpop.f32.mrb[116].mxu0 }
 0x566   :  { %3257 = vst.msk [vmem:[%s6409_s3 + $0x90] sm:$0xff] %vm63_vm0, %v3219_v40  ;;  %v3039_v29 = vadd.f32 %v4295_v37, %v6176_v2  ;;  %v3033_v11 = vpop.f32.mrb[117].mxu0 }
 0x567   :  { %v3034_v31 = vadd.f32 %v3033_v11, %v6176_v2 }
 0x568   :  { %v3222_v56 = vadd.f32 %v5761_v38, %v3039_v29 }
 0x569   :  { %v3221_v26 = vadd.f32 %v5770_v19, %v3034_v31  ;;  %v4298_v43 = vpop.f32.mrb[118].mxu0 }
 0x56a   :  { %3260 = vst.msk [vmem:[%s6409_s3 + $0xa8] sm:$0xff] %vm63_vm0, %v3222_v56  ;;  %v3049_v12 = vadd.f32 %v4298_v43, %v6176_v2  ;;  %v3043_v46 = vpop.f32.mrb[119].mxu0 }
 0x56b   :  { %3259 = vst.msk [vmem:[%s6409_s3 + $0xa0] sm:$0xff] %vm63_vm0, %v3221_v26  ;;  %v3044_v44 = vadd.f32 %v3043_v46, %v6176_v2 }
 0x56c   :  { %v3224_v38 = vadd.f32 %v6499_v53, %v3049_v12 }
 0x56d   :  { %v3223_v19 = vadd.f32 %v6500_v48, %v3044_v44 }
 0x56e   :  { %3262 = vst.msk [vmem:[%s6409_s3 + $0xb8] sm:$0xff] %vm63_vm0, %v3224_v38 }
 0x56f   :  { %3261 = vst.msk [vmem:[%s6409_s3 + $0xb0] sm:$0xff] %vm63_vm0, %v3223_v19 }
 0x570   :  { %v4301_v18 = vpop.f32.mrb[120].mxu0 }
 0x571   :  { %v3059_v39 = vadd.f32 %v4301_v18, %v6176_v2  ;;  %v3053_v33 = vpop.f32.mrb[121].mxu0 }
 0x572   :  { %v3054_v60 = vadd.f32 %v3053_v33, %v6176_v2 }
 0x573   :  { %v3226_v24 = vadd.f32 %v6501_v27, %v3059_v39 }
 0x574   :  { %v3225_v22 = vadd.f32 %v5848_v28, %v3054_v60  ;;  %v4304_v13 = vpop.f32.mrb[122].mxu0 }
 0x575   :  { %3264 = vst.msk [vmem:[%s6409_s3 + $0xc8] sm:$0xff] %vm63_vm0, %v3226_v24  ;;  %v3069_v6 = vadd.f32 %v4304_v13, %v6176_v2  ;;  %v3063_v55 = vpop.f32.mrb[123].mxu0 }
 0x576   :  { %3263 = vst.msk [vmem:[%s6409_s3 + $0xc0] sm:$0xff] %vm63_vm0, %v3225_v22  ;;  %v3064_v7 = vadd.f32 %v3063_v55, %v6176_v2 }
 0x577   :  { %v3228_v52 = vadd.f32 %v5858_v58, %v3069_v6 }
 0x578   :  { %v3227_v28 = vadd.f32 %v5878_v1, %v3064_v7 }
 0x579   :  { %3266 = vst.msk [vmem:[%s6409_s3 + $0xd8] sm:$0xff] %vm63_vm0, %v3228_v52  ;;  %v4307_v51 = vpop.f32.mrb[124].mxu0 }
 0x57a   :  { %3265 = vst.msk [vmem:[%s6409_s3 + $0xd0] sm:$0xff] %vm63_vm0, %v3227_v28  ;;  %v3079_v35 = vadd.f32 %v4307_v51, %v6176_v2  ;;  %v3073_v49 = vpop.f32.mrb[125].mxu0 }
 0x57b   :  { %v3074_v16 = vadd.f32 %v3073_v49, %v6176_v2 }
 0x57c   :  { %v3230_v58 = vadd.f32 %v5886_v10, %v3079_v35 }
 0x57d   :  { %v3229_v1 = vadd.f32 %v5906_v59, %v3074_v16 }
 0x57e   :  { %v4310_v14 = vpop.f32.mrb[126].mxu0  ;;  %3268 = vst.msk [vmem:[%s6409_s3 + $0xe8] sm:$0xff] %vm63_vm0, %v3230_v58 }
 0x57f   :  { %v3089_v4 = vadd.f32 %v4310_v14, %v6176_v2  ;;  %v3083_v30 = vpop.f32.mrb[127].mxu0  ;;  %3267 = vst.msk [vmem:[%s6409_s3 + $0xe0] sm:$0xff] %vm63_vm0, %v3229_v1 }
 0x580   :  { %v3084_v20 = vadd.f32 %v3083_v30, %v6176_v2 }
 0x581   :  { %v3232_v10 = vadd.f32 %v5915_v54, %v3089_v4 }
 0x582   :  { %v3231_v59 = vadd.f32 %v5927_v25, %v3084_v20  ;;  %v4313_v23 = vpop.f32.mrb[128].mxu0 }
 0x583   :  { %3270 = vst.msk [vmem:[%s6409_s3 + $0xf8] sm:$0xff] %vm63_vm0, %v3232_v10  ;;  %v3099_v57 = vadd.f32 %v4313_v23, %v6176_v2  ;;  %v3093_v63 = vpop.f32.mrb[129].mxu0 }
 0x584   :  { %3269 = vst.msk [vmem:[%s6409_s3 + $0xf0] sm:$0xff] %vm63_vm0, %v3231_v59  ;;  %v3094_v8 = vadd.f32 %v3093_v63, %v6176_v2 }
 0x585   :  { %v3234_v54 = vadd.f32 %v5940_v41, %v3099_v57 }
 0x586   :  { %v3233_v25 = vadd.f32 %v5951_v17, %v3094_v8  ;;  %v4316_v36 = vpop.f32.mrb[130].mxu0 }
 0x587   :  { %3272 = vst.msk [vmem:[%s6409_s3 + $0x108] sm:$0xff] %vm63_vm0, %v3234_v54  ;;  %v3109_v3 = vadd.f32 %v4316_v36, %v6176_v2  ;;  %v3103_v15 = vpop.f32.mrb[131].mxu0 }
 0x588   :  { %3271 = vst.msk [vmem:[%s6409_s3 + $0x100] sm:$0xff] %vm63_vm0, %v3233_v25  ;;  %v3104_v42 = vadd.f32 %v3103_v15, %v6176_v2 }
 0x589   :  { %v3236_v41 = vadd.f32 %v5964_v45, %v3109_v3 }
 0x58a   :  { %v3235_v17 = vadd.f32 %v5969_v9, %v3104_v42  ;;  %v4319_v34 = vpop.f32.mrb[132].mxu0 }
 0x58b   :  { %3274 = vst.msk [vmem:[%s6409_s3 + $0x118] sm:$0xff] %vm63_vm0, %v3236_v41  ;;  %v3119_v5 = vadd.f32 %v4319_v34, %v6176_v2  ;;  %v3113_v61 = vpop.f32.mrb[133].mxu0 }
 0x58c   :  { %3273 = vst.msk [vmem:[%s6409_s3 + $0x110] sm:$0xff] %vm63_vm0, %v3235_v17  ;;  %v3114_v62 = vadd.f32 %v3113_v61, %v6176_v2 }
 0x58d   :  { %v3238_v45 = vadd.f32 %v5988_v47, %v3119_v5 }
 0x58e   :  { %v3237_v9 = vadd.f32 %v5993_v32, %v3114_v62 }
 0x58f   :  { %3276 = vst.msk [vmem:[%s6409_s3 + $0x128] sm:$0xff] %vm63_vm0, %v3238_v45 }
 0x590   :  { %3275 = vst.msk [vmem:[%s6409_s3 + $0x120] sm:$0xff] %vm63_vm0, %v3237_v9 }

</bundles_post_ra>
